<compile_context>
chip_gen: v7x
topology: tpu7x:2x2x1
jax: 0.10.0
libtpu: 0.0.40
codegen_flags: <defaults>
</compile_context>

<pallas_src>
from functools import partial

import numpy as np

import jax
import jax.numpy as jnp
from jax.experimental import pallas as pl
from jax.experimental.pallas import tpu as pltpu


# ---------------------------------------------------------------------------
# Fused Pallas kernel: conv1+relu -> conv2+relu -> conv3+relu -> avgpool
# ---------------------------------------------------------------------------
def _conv_relu(a, s_ref, m_ref, b_ref):
    """One stride-2 pad-1 3x3 conv + ReLU on a TB-stacked, row-flattened input.

    a      : (TB*H, W*Cin)  bf16   stacked layer input (image b = rows b*H..)
    s_ref  : (3*TB*Ho, TB*H) bf16  dy-stacked, block-diag row-tap selection
    m_ref  : (3, W*Cin, Wo*Cout) bf16  packed weights (W taps+stride+pad+mix)
    b_ref  : (1, Wo*Cout)   f32    bias tiled along Wo
    returns: (TB*Ho, Wo*Cout) f32
    """
    tb_ho = s_ref.shape[0] // 3
    # Single selection matmul per layer (S is 0/1 -> exact in bf16); its rows
    # are the stride-2 / pad-1 input rows for every (tap, image, out-row).
    sel = jnp.dot(s_ref[...], a, preferred_element_type=jnp.float32)
    acc = None
    for dy in range(3):              # static unroll: 3 tap matmul-accumulates
        rows = sel[dy * tb_ho:(dy + 1) * tb_ho, :].astype(jnp.bfloat16)
        part = jnp.dot(rows, m_ref[dy], preferred_element_type=jnp.float32)
        acc = part if acc is None else acc + part
    return jnp.maximum(acc + b_ref[...], 0.0)   # bias + ReLU in f32 (VPU)


def fused_cnn_kernel(x_ref, s1, m1, b1, s2, m2, b2, s3, m3, b3,
                     pr_ref, pc_ref, o_ref):
    a = x_ref[...]                                       # (TB*H, W*Cin4) bf16
    a = _conv_relu(a, s1, m1, b1).astype(jnp.bfloat16)   # (TB*H/2, (W/2)*16)
    a = _conv_relu(a, s2, m2, b2).astype(jnp.bfloat16)   # (TB*H/4, (W/4)*16)
    a = _conv_relu(a, s3, m3, b3).astype(jnp.bfloat16)   # (TB*H/8, (W/8)*10)
    # avg_pool2d(4) + flatten: per-image row sums (block-diag 0/1 matmul) then
    # a per-channel pooling matmul that carries the 1/(Ho*Wo) scale.
    pooled = jnp.dot(pr_ref[...], a, preferred_element_type=jnp.float32)
    o_ref[...] = jnp.dot(pooled.astype(jnp.bfloat16), pc_ref[...],
                         preferred_element_type=jnp.float32)   # (TB, Cout)


# ---------------------------------------------------------------------------
# Host-side weight packing (data-independent; done once, outside the kernel)
# ---------------------------------------------------------------------------
def _pack_conv(w_hwio, bias, H, W, cin_pack, TB):
    """Pack one conv layer for the batched row-tap matmul formulation."""
    w_np = np.asarray(w_hwio, np.float32)       # (3, 3, Cin, Cout)
    b_np = np.asarray(bias, np.float32)         # (Cout,)
    Cin, Cout = w_np.shape[2], w_np.shape[3]
    Ho, Wo = H // 2, W // 2

    # S[dy*TB*Ho + b*Ho + ho, b*H + h] = 1 iff padded row 2*ho+dy maps to h.
    S = np.zeros((3 * TB * Ho, TB * H), np.float32)
    for dy in range(3):
        for b in range(TB):
            for ho in range(Ho):
                h = 2 * ho + dy - 1
                if 0 <= h < H:
                    S[dy * TB * Ho + b * Ho + ho, b * H + h] = 1.0

    # M[dy, w*cin_pack+ci, wo*Cout+co] = W[dy, dx, ci, co], dx = w - 2*wo + 1.
    # (cin_pack may be > Cin for the lane-padded first layer; extra rows = 0.)
    M = np.zeros((3, W * cin_pack, Wo * Cout), np.float32)
    for dy in range(3):
        for dx in range(3):
            for wo in range(Wo):
                w_in = 2 * wo + dx - 1
                if 0 <= w_in < W:
                    M[dy,
                      w_in * cin_pack:w_in * cin_pack + Cin,
                      wo * Cout:(wo + 1) * Cout] = w_np[dy, dx]

    b_t = np.tile(b_np, Wo).reshape(1, Wo * Cout)
    return (jnp.asarray(S, jnp.bfloat16),
            jnp.asarray(M, jnp.bfloat16),
            jnp.asarray(b_t, jnp.float32))


def pack_params(params, H, W, TB, cin_pad=4):
    """Pack the three conv layers plus the two avg-pool matrices."""
    packed = []
    h, w = H, W
    cin_pack = cin_pad                    # conv1: Cin padded 3 -> 4 (K = 128)
    for (wt, b) in params:
        packed.append(_pack_conv(wt, b, h, w, cin_pack, TB))
        h, w = h // 2, w // 2
        cin_pack = int(np.asarray(wt).shape[-1])   # next Cin = this Cout
    Cout = int(np.asarray(params[-1][0]).shape[-1])
    Ho, Wo = h, w                         # final spatial (4x4 at 32x32 input)

    # PR[b, b*Ho + r] = 1 : per-image sum over the Ho stacked rows.
    PR = np.zeros((TB, TB * Ho), np.float32)
    for b in range(TB):
        PR[b, b * Ho:(b + 1) * Ho] = 1.0
    # PC[wo*Cout + c, c] = 1/(Ho*Wo) : sum over Wo positions + mean scale.
    PC = np.zeros((Wo * Cout, Cout), np.float32)
    for wo in range(Wo):
        for c in range(Cout):
            PC[wo * Cout + c, c] = 1.0 / float(Ho * Wo)
    return packed, jnp.asarray(PR, jnp.bfloat16), jnp.asarray(PC, jnp.bfloat16)


# ---------------------------------------------------------------------------
# Forward wrapper (single pallas_call, TB images per grid step)
# ---------------------------------------------------------------------------
@partial(jax.jit, static_argnames=("TB",))
def mnist_cnn_forward(x_nchw, packed, pool_row, pool_col, *, TB):
    """x_nchw: (B, 3, H, W) float32 (PyTorch layout at the API)."""
    B, Cin, H, W = x_nchw.shape
    assert B % TB == 0, "batch must be a multiple of the batch tile TB"
    cin_pack = 4
    # NCHW -> NHWC, zero-pad Cin 3->4 (lane-aligns conv1's K dim to W*4 = 128),
    # row-flatten and stack all images along rows once: (B*H, W*4), bf16.
    a0 = jnp.transpose(x_nchw, (0, 2, 3, 1))
    a0 = jnp.pad(a0, ((0, 0), (0, 0), (0, 0), (0, cin_pack - Cin)))
    a0 = a0.reshape(B * H, W * cin_pack).astype(jnp.bfloat16)

    (s1, m1, b1), (s2, m2, b2), (s3, m3, b3) = packed
    Cout = pool_col.shape[1]
    operands = [a0, s1, m1, b1, s2, m2, b2, s3, m3, b3, pool_row, pool_col]

    in_specs = [pl.BlockSpec((TB * H, W * cin_pack), lambda i: (i, 0))]
    for op in operands[1:]:
        in_specs.append(pl.BlockSpec(op.shape, lambda i, _nd=op.ndim: (0,) * _nd))

    out = pl.pallas_call(
        fused_cnn_kernel,
        out_shape=jax.ShapeDtypeStruct((B, Cout), jnp.float32),
        grid=(B // TB,),
        in_specs=in_specs,
        out_specs=pl.BlockSpec((TB, Cout), lambda i: (i, 0)),
        compiler_params=pltpu.CompilerParams(
            dimension_semantics=("parallel",)),
    )(*operands)
    return out


# ---------------------------------------------------------------------------
# Pure-JAX reference (f32, for correctness check)
# ---------------------------------------------------------------------------
def reference_forward(x_nchw, params):
    x = x_nchw
    for (w, b) in params:
        w_oihw = jnp.transpose(w, (3, 2, 0, 1))
        x = jax.lax.conv_general_dilated(
            x, w_oihw, window_strides=(2, 2), padding=((1, 1), (1, 1)),
            dimension_numbers=("NCHW", "OIHW", "NCHW"))
        x = jnp.maximum(x + b.reshape(1, -1, 1, 1), 0.0)
    x = jax.lax.reduce_window(x, 0.0, jax.lax.add,
                              (1, 1, 4, 4), (1, 1, 4, 4), "VALID") / 16.0
    return x.reshape(x.shape[0], -1)


# ---------------------------------------------------------------------------
# Main
# ---------------------------------------------------------------------------
if __name__ == "__main__":
    key = jax.random.PRNGKey(0)
    kx, k1, k2, k3, kb1, kb2, kb3 = jax.random.split(key, 7)

    B, Cin, H, W = 16, 3, 32, 32
    TB = 8   # images per grid step -> grid=(2,): both v7x TensorCores get work
    x = jax.random.normal(kx, (B, Cin, H, W), dtype=jnp.float32)

    # Deterministic parameter init (shapes from the module __init__), HWIO layout.
    params = [
        (0.1 * jax.random.normal(k1, (3, 3, 3, 16), jnp.float32),
         0.1 * jax.random.normal(kb1, (16,), jnp.float32)),
        (0.1 * jax.random.normal(k2, (3, 3, 16, 16), jnp.float32),
         0.1 * jax.random.normal(kb2, (16,), jnp.float32)),
        (0.1 * jax.random.normal(k3, (3, 3, 16, 10), jnp.float32),
         0.1 * jax.random.normal(kb3, (10,), jnp.float32)),
    ]

    packed, pool_row, pool_col = pack_params(params, H, W, TB)

    out = jax.block_until_ready(
        mnist_cnn_forward(x, packed, pool_row, pool_col, TB=TB))
    ref = jax.block_until_ready(reference_forward(x, params))

    assert out.shape == (B, 10), out.shape
    # bf16 operands (f32 accumulation) -> loosened tolerance vs. f32 reference.
    assert jnp.allclose(out, ref, atol=3e-2, rtol=3e-2), "mismatch vs reference"
    print("KERNEL_OK")
</pallas_src>

<mosaic_0001>
module attributes {stable_mosaic.version = 11 : i64} {
  func.func @fused_cnn_kernel(%arg0: i32, %arg1: memref<256x128xbf16, #tpu.memory_space<vmem>>, %arg2: memref<384x256xbf16, #tpu.memory_space<vmem>>, %arg3: memref<3x128x256xbf16, #tpu.memory_space<vmem>>, %arg4: memref<1x256xf32, #tpu.memory_space<vmem>>, %arg5: memref<192x128xbf16, #tpu.memory_space<vmem>>, %arg6: memref<3x256x128xbf16, #tpu.memory_space<vmem>>, %arg7: memref<1x128xf32, #tpu.memory_space<vmem>>, %arg8: memref<96x64xbf16, #tpu.memory_space<vmem>>, %arg9: memref<3x128x40xbf16, #tpu.memory_space<vmem>>, %arg10: memref<1x40xf32, #tpu.memory_space<vmem>>, %arg11: memref<8x32xbf16, #tpu.memory_space<vmem>>, %arg12: memref<40x10xbf16, #tpu.memory_space<vmem>>, %arg13: memref<8x10xf32, #tpu.memory_space<vmem>>) attributes {dimension_semantics = [#tpu.dimension_semantics<parallel>], iteration_bounds = array<i64: 2>, scalar_prefetch = 0 : i64, scratch_operands = 0 : i64, tpu.core_type = #tpu.core_type<tc>, window_params = [{transform_indices = @transform_0, window_bounds = array<i64: 256, 128>}, {pipeline_mode = #tpu.pipeline_mode<synchronous>, transform_indices = @transform_1, window_bounds = array<i64: 384, 256>}, {pipeline_mode = #tpu.pipeline_mode<synchronous>, transform_indices = @transform_2, window_bounds = array<i64: 3, 128, 256>}, {pipeline_mode = #tpu.pipeline_mode<synchronous>, transform_indices = @transform_3, window_bounds = array<i64: 1, 256>}, {pipeline_mode = #tpu.pipeline_mode<synchronous>, transform_indices = @transform_4, window_bounds = array<i64: 192, 128>}, {pipeline_mode = #tpu.pipeline_mode<synchronous>, transform_indices = @transform_5, window_bounds = array<i64: 3, 256, 128>}, {pipeline_mode = #tpu.pipeline_mode<synchronous>, transform_indices = @transform_6, window_bounds = array<i64: 1, 128>}, {pipeline_mode = #tpu.pipeline_mode<synchronous>, transform_indices = @transform_7, window_bounds = array<i64: 96, 64>}, {pipeline_mode = #tpu.pipeline_mode<synchronous>, transform_indices = @transform_8, window_bounds = array<i64: 3, 128, 40>}, {pipeline_mode = #tpu.pipeline_mode<synchronous>, transform_indices = @transform_9, window_bounds = array<i64: 1, 40>}, {pipeline_mode = #tpu.pipeline_mode<synchronous>, transform_indices = @transform_10, window_bounds = array<i64: 8, 32>}, {pipeline_mode = #tpu.pipeline_mode<synchronous>, transform_indices = @transform_11, window_bounds = array<i64: 40, 10>}, {transform_indices = @transform_12, window_bounds = array<i64: 8, 10>}]} {
    %c0 = arith.constant 0 : index
    %c0_0 = arith.constant 0 : index
    %0 = vector.load %arg1[%c0, %c0_0] : memref<256x128xbf16, #tpu.memory_space<vmem>>, vector<256x128xbf16>
    %c0_1 = arith.constant 0 : index
    %c0_2 = arith.constant 0 : index
    %1 = vector.load %arg2[%c0_1, %c0_2] : memref<384x256xbf16, #tpu.memory_space<vmem>>, vector<384x256xbf16>
    %cst = arith.constant dense<0.000000e+00> : vector<384x128xf32>
    %2 = tpu.matmul %1, %0, %cst {dimension_numbers = #tpu.dot_dimension_numbers<[1], [0], [0], [1], [0, 0, 1, 1], [], []>} : vector<384x256xbf16>, vector<256x128xbf16>, vector<384x128xf32> -> vector<384x128xf32>
    %3 = vector.extract_strided_slice %2 {offsets = [0, 0], sizes = [128, 128], strides = [1, 1]} : vector<384x128xf32> to vector<128x128xf32>
    %4 = arith.truncf %3 : vector<128x128xf32> to vector<128x128xbf16>
    %c0_3 = arith.constant 0 : index
    %c0_4 = arith.constant 0 : index
    %c0_5 = arith.constant 0 : index
    %5 = vector.load %arg3[%c0_3, %c0_4, %c0_5] : memref<3x128x256xbf16, #tpu.memory_space<vmem>>, vector<1x128x256xbf16>
    %6 = vector.shape_cast %5 : vector<1x128x256xbf16> to vector<128x256xbf16>
    %cst_6 = arith.constant dense<0.000000e+00> : vector<128x256xf32>
    %7 = tpu.matmul %4, %6, %cst_6 {dimension_numbers = #tpu.dot_dimension_numbers<[1], [0], [0], [1], [0, 0, 1, 1], [], []>} : vector<128x128xbf16>, vector<128x256xbf16>, vector<128x256xf32> -> vector<128x256xf32>
    %8 = vector.extract_strided_slice %2 {offsets = [128, 0], sizes = [128, 128], strides = [1, 1]} : vector<384x128xf32> to vector<128x128xf32>
    %9 = arith.truncf %8 : vector<128x128xf32> to vector<128x128xbf16>
    %c1 = arith.constant 1 : index
    %c0_7 = arith.constant 0 : index
    %c0_8 = arith.constant 0 : index
    %10 = vector.load %arg3[%c1, %c0_7, %c0_8] : memref<3x128x256xbf16, #tpu.memory_space<vmem>>, vector<1x128x256xbf16>
    %11 = vector.shape_cast %10 : vector<1x128x256xbf16> to vector<128x256xbf16>
    %cst_9 = arith.constant dense<0.000000e+00> : vector<128x256xf32>
    %12 = tpu.matmul %9, %11, %cst_9 {dimension_numbers = #tpu.dot_dimension_numbers<[1], [0], [0], [1], [0, 0, 1, 1], [], []>} : vector<128x128xbf16>, vector<128x256xbf16>, vector<128x256xf32> -> vector<128x256xf32>
    %13 = arith.addf %7, %12 : vector<128x256xf32>
    %14 = vector.extract_strided_slice %2 {offsets = [256, 0], sizes = [128, 128], strides = [1, 1]} : vector<384x128xf32> to vector<128x128xf32>
    %15 = arith.truncf %14 : vector<128x128xf32> to vector<128x128xbf16>
    %c2 = arith.constant 2 : index
    %c0_10 = arith.constant 0 : index
    %c0_11 = arith.constant 0 : index
    %16 = vector.load %arg3[%c2, %c0_10, %c0_11] : memref<3x128x256xbf16, #tpu.memory_space<vmem>>, vector<1x128x256xbf16>
    %17 = vector.shape_cast %16 : vector<1x128x256xbf16> to vector<128x256xbf16>
    %cst_12 = arith.constant dense<0.000000e+00> : vector<128x256xf32>
    %18 = tpu.matmul %15, %17, %cst_12 {dimension_numbers = #tpu.dot_dimension_numbers<[1], [0], [0], [1], [0, 0, 1, 1], [], []>} : vector<128x128xbf16>, vector<128x256xbf16>, vector<128x256xf32> -> vector<128x256xf32>
    %19 = arith.addf %13, %18 : vector<128x256xf32>
    %c0_13 = arith.constant 0 : index
    %c0_14 = arith.constant 0 : index
    %20 = vector.load %arg4[%c0_13, %c0_14] : memref<1x256xf32, #tpu.memory_space<vmem>>, vector<1x256xf32>
    %21 = vector.broadcast %20 : vector<1x256xf32> to vector<128x256xf32>
    %22 = arith.addf %19, %21 : vector<128x256xf32>
    %cst_15 = arith.constant 0.000000e+00 : f32
    %23 = vector.broadcast %cst_15 : f32 to vector<128x256xf32>
    %24 = arith.maximumf %22, %23 : vector<128x256xf32>
    %25 = arith.truncf %24 : vector<128x256xf32> to vector<128x256xbf16>
    %c0_16 = arith.constant 0 : index
    %c0_17 = arith.constant 0 : index
    %26 = vector.load %arg5[%c0_16, %c0_17] : memref<192x128xbf16, #tpu.memory_space<vmem>>, vector<192x128xbf16>
    %cst_18 = arith.constant dense<0.000000e+00> : vector<192x256xf32>
    %27 = tpu.matmul %26, %25, %cst_18 {dimension_numbers = #tpu.dot_dimension_numbers<[1], [0], [0], [1], [0, 0, 1, 1], [], []>} : vector<192x128xbf16>, vector<128x256xbf16>, vector<192x256xf32> -> vector<192x256xf32>
    %28 = vector.extract_strided_slice %27 {offsets = [0, 0], sizes = [64, 256], strides = [1, 1]} : vector<192x256xf32> to vector<64x256xf32>
    %29 = arith.truncf %28 : vector<64x256xf32> to vector<64x256xbf16>
    %c0_19 = arith.constant 0 : index
    %c0_20 = arith.constant 0 : index
    %c0_21 = arith.constant 0 : index
    %30 = vector.load %arg6[%c0_19, %c0_20, %c0_21] : memref<3x256x128xbf16, #tpu.memory_space<vmem>>, vector<1x256x128xbf16>
    %31 = vector.shape_cast %30 : vector<1x256x128xbf16> to vector<256x128xbf16>
    %cst_22 = arith.constant dense<0.000000e+00> : vector<64x128xf32>
    %32 = tpu.matmul %29, %31, %cst_22 {dimension_numbers = #tpu.dot_dimension_numbers<[1], [0], [0], [1], [0, 0, 1, 1], [], []>} : vector<64x256xbf16>, vector<256x128xbf16>, vector<64x128xf32> -> vector<64x128xf32>
    %33 = vector.extract_strided_slice %27 {offsets = [64, 0], sizes = [64, 256], strides = [1, 1]} : vector<192x256xf32> to vector<64x256xf32>
    %34 = arith.truncf %33 : vector<64x256xf32> to vector<64x256xbf16>
    %c1_23 = arith.constant 1 : index
    %c0_24 = arith.constant 0 : index
    %c0_25 = arith.constant 0 : index
    %35 = vector.load %arg6[%c1_23, %c0_24, %c0_25] : memref<3x256x128xbf16, #tpu.memory_space<vmem>>, vector<1x256x128xbf16>
    %36 = vector.shape_cast %35 : vector<1x256x128xbf16> to vector<256x128xbf16>
    %cst_26 = arith.constant dense<0.000000e+00> : vector<64x128xf32>
    %37 = tpu.matmul %34, %36, %cst_26 {dimension_numbers = #tpu.dot_dimension_numbers<[1], [0], [0], [1], [0, 0, 1, 1], [], []>} : vector<64x256xbf16>, vector<256x128xbf16>, vector<64x128xf32> -> vector<64x128xf32>
    %38 = arith.addf %32, %37 : vector<64x128xf32>
    %39 = vector.extract_strided_slice %27 {offsets = [128, 0], sizes = [64, 256], strides = [1, 1]} : vector<192x256xf32> to vector<64x256xf32>
    %40 = arith.truncf %39 : vector<64x256xf32> to vector<64x256xbf16>
    %c2_27 = arith.constant 2 : index
    %c0_28 = arith.constant 0 : index
    %c0_29 = arith.constant 0 : index
    %41 = vector.load %arg6[%c2_27, %c0_28, %c0_29] : memref<3x256x128xbf16, #tpu.memory_space<vmem>>, vector<1x256x128xbf16>
    %42 = vector.shape_cast %41 : vector<1x256x128xbf16> to vector<256x128xbf16>
    %cst_30 = arith.constant dense<0.000000e+00> : vector<64x128xf32>
    %43 = tpu.matmul %40, %42, %cst_30 {dimension_numbers = #tpu.dot_dimension_numbers<[1], [0], [0], [1], [0, 0, 1, 1], [], []>} : vector<64x256xbf16>, vector<256x128xbf16>, vector<64x128xf32> -> vector<64x128xf32>
    %44 = arith.addf %38, %43 : vector<64x128xf32>
    %c0_31 = arith.constant 0 : index
    %c0_32 = arith.constant 0 : index
    %45 = vector.load %arg7[%c0_31, %c0_32] : memref<1x128xf32, #tpu.memory_space<vmem>>, vector<1x128xf32>
    %46 = vector.broadcast %45 : vector<1x128xf32> to vector<64x128xf32>
    %47 = arith.addf %44, %46 : vector<64x128xf32>
    %cst_33 = arith.constant 0.000000e+00 : f32
    %48 = vector.broadcast %cst_33 : f32 to vector<64x128xf32>
    %49 = arith.maximumf %47, %48 : vector<64x128xf32>
    %50 = arith.truncf %49 : vector<64x128xf32> to vector<64x128xbf16>
    %c0_34 = arith.constant 0 : index
    %c0_35 = arith.constant 0 : index
    %51 = vector.load %arg8[%c0_34, %c0_35] : memref<96x64xbf16, #tpu.memory_space<vmem>>, vector<96x64xbf16>
    %cst_36 = arith.constant dense<0.000000e+00> : vector<96x128xf32>
    %52 = tpu.matmul %51, %50, %cst_36 {dimension_numbers = #tpu.dot_dimension_numbers<[1], [0], [0], [1], [0, 0, 1, 1], [], []>} : vector<96x64xbf16>, vector<64x128xbf16>, vector<96x128xf32> -> vector<96x128xf32>
    %53 = vector.extract_strided_slice %52 {offsets = [0, 0], sizes = [32, 128], strides = [1, 1]} : vector<96x128xf32> to vector<32x128xf32>
    %54 = arith.truncf %53 : vector<32x128xf32> to vector<32x128xbf16>
    %c0_37 = arith.constant 0 : index
    %c0_38 = arith.constant 0 : index
    %c0_39 = arith.constant 0 : index
    %55 = vector.load %arg9[%c0_37, %c0_38, %c0_39] : memref<3x128x40xbf16, #tpu.memory_space<vmem>>, vector<1x128x40xbf16>
    %56 = vector.shape_cast %55 : vector<1x128x40xbf16> to vector<128x40xbf16>
    %cst_40 = arith.constant dense<0.000000e+00> : vector<32x40xf32>
    %57 = tpu.matmul %54, %56, %cst_40 {dimension_numbers = #tpu.dot_dimension_numbers<[1], [0], [0], [1], [0, 0, 1, 1], [], []>} : vector<32x128xbf16>, vector<128x40xbf16>, vector<32x40xf32> -> vector<32x40xf32>
    %58 = vector.extract_strided_slice %52 {offsets = [32, 0], sizes = [32, 128], strides = [1, 1]} : vector<96x128xf32> to vector<32x128xf32>
    %59 = arith.truncf %58 : vector<32x128xf32> to vector<32x128xbf16>
    %c1_41 = arith.constant 1 : index
    %c0_42 = arith.constant 0 : index
    %c0_43 = arith.constant 0 : index
    %60 = vector.load %arg9[%c1_41, %c0_42, %c0_43] : memref<3x128x40xbf16, #tpu.memory_space<vmem>>, vector<1x128x40xbf16>
    %61 = vector.shape_cast %60 : vector<1x128x40xbf16> to vector<128x40xbf16>
    %cst_44 = arith.constant dense<0.000000e+00> : vector<32x40xf32>
    %62 = tpu.matmul %59, %61, %cst_44 {dimension_numbers = #tpu.dot_dimension_numbers<[1], [0], [0], [1], [0, 0, 1, 1], [], []>} : vector<32x128xbf16>, vector<128x40xbf16>, vector<32x40xf32> -> vector<32x40xf32>
    %63 = arith.addf %57, %62 : vector<32x40xf32>
    %64 = vector.extract_strided_slice %52 {offsets = [64, 0], sizes = [32, 128], strides = [1, 1]} : vector<96x128xf32> to vector<32x128xf32>
    %65 = arith.truncf %64 : vector<32x128xf32> to vector<32x128xbf16>
    %c2_45 = arith.constant 2 : index
    %c0_46 = arith.constant 0 : index
    %c0_47 = arith.constant 0 : index
    %66 = vector.load %arg9[%c2_45, %c0_46, %c0_47] : memref<3x128x40xbf16, #tpu.memory_space<vmem>>, vector<1x128x40xbf16>
    %67 = vector.shape_cast %66 : vector<1x128x40xbf16> to vector<128x40xbf16>
    %cst_48 = arith.constant dense<0.000000e+00> : vector<32x40xf32>
    %68 = tpu.matmul %65, %67, %cst_48 {dimension_numbers = #tpu.dot_dimension_numbers<[1], [0], [0], [1], [0, 0, 1, 1], [], []>} : vector<32x128xbf16>, vector<128x40xbf16>, vector<32x40xf32> -> vector<32x40xf32>
    %69 = arith.addf %63, %68 : vector<32x40xf32>
    %c0_49 = arith.constant 0 : index
    %c0_50 = arith.constant 0 : index
    %70 = vector.load %arg10[%c0_49, %c0_50] : memref<1x40xf32, #tpu.memory_space<vmem>>, vector<1x40xf32>
    %71 = vector.broadcast %70 : vector<1x40xf32> to vector<32x40xf32>
    %72 = arith.addf %69, %71 : vector<32x40xf32>
    %cst_51 = arith.constant 0.000000e+00 : f32
    %73 = vector.broadcast %cst_51 : f32 to vector<32x40xf32>
    %74 = arith.maximumf %72, %73 : vector<32x40xf32>
    %75 = arith.truncf %74 : vector<32x40xf32> to vector<32x40xbf16>
    %c0_52 = arith.constant 0 : index
    %c0_53 = arith.constant 0 : index
    %76 = vector.load %arg11[%c0_52, %c0_53] : memref<8x32xbf16, #tpu.memory_space<vmem>>, vector<8x32xbf16>
    %cst_54 = arith.constant dense<0.000000e+00> : vector<8x40xf32>
    %77 = tpu.matmul %76, %75, %cst_54 {dimension_numbers = #tpu.dot_dimension_numbers<[1], [0], [0], [1], [0, 0, 1, 1], [], []>} : vector<8x32xbf16>, vector<32x40xbf16>, vector<8x40xf32> -> vector<8x40xf32>
    %78 = arith.truncf %77 : vector<8x40xf32> to vector<8x40xbf16>
    %c0_55 = arith.constant 0 : index
    %c0_56 = arith.constant 0 : index
    %79 = vector.load %arg12[%c0_55, %c0_56] : memref<40x10xbf16, #tpu.memory_space<vmem>>, vector<40x10xbf16>
    %cst_57 = arith.constant dense<0.000000e+00> : vector<8x10xf32>
    %80 = tpu.matmul %78, %79, %cst_57 {dimension_numbers = #tpu.dot_dimension_numbers<[1], [0], [0], [1], [0, 0, 1, 1], [], []>} : vector<8x40xbf16>, vector<40x10xbf16>, vector<8x10xf32> -> vector<8x10xf32>
    %c0_58 = arith.constant 0 : index
    %c0_59 = arith.constant 0 : index
    %81 = vector.load %arg13[%c0_58, %c0_59] : memref<8x10xf32, #tpu.memory_space<vmem>>, vector<8x10xf32>
    tpu.vector_store %arg13[%c0_58, %c0_59], %80 {strides = array<i32>} : memref<8x10xf32, #tpu.memory_space<vmem>>, vector<8x10xf32>,
    return
  }
  func.func @transform_0(%arg0: i32) -> (i32, i32) {
    %c0_i32 = arith.constant 0 : i32
    %c0_i32_0 = arith.constant 0 : i32
    return %arg0, %c0_i32 : i32, i32
  }
  func.func @transform_1(%arg0: i32) -> (i32, i32) {
    %c0_i32 = arith.constant 0 : i32
    %c0_i32_0 = arith.constant 0 : i32
    %c0_i32_1 = arith.constant 0 : i32
    return %c0_i32, %c0_i32_0 : i32, i32
  }
  func.func @transform_2(%arg0: i32) -> (i32, i32, i32) {
    %c0_i32 = arith.constant 0 : i32
    %c0_i32_0 = arith.constant 0 : i32
    %c0_i32_1 = arith.constant 0 : i32
    %c0_i32_2 = arith.constant 0 : i32
    return %c0_i32, %c0_i32_0, %c0_i32_1 : i32, i32, i32
  }
  func.func @transform_3(%arg0: i32) -> (i32, i32) {
    %c0_i32 = arith.constant 0 : i32
    %c0_i32_0 = arith.constant 0 : i32
    %c0_i32_1 = arith.constant 0 : i32
    return %c0_i32, %c0_i32_0 : i32, i32
  }
  func.func @transform_4(%arg0: i32) -> (i32, i32) {
    %c0_i32 = arith.constant 0 : i32
    %c0_i32_0 = arith.constant 0 : i32
    %c0_i32_1 = arith.constant 0 : i32
    return %c0_i32, %c0_i32_0 : i32, i32
  }
  func.func @transform_5(%arg0: i32) -> (i32, i32, i32) {
    %c0_i32 = arith.constant 0 : i32
    %c0_i32_0 = arith.constant 0 : i32
    %c0_i32_1 = arith.constant 0 : i32
    %c0_i32_2 = arith.constant 0 : i32
    return %c0_i32, %c0_i32_0, %c0_i32_1 : i32, i32, i32
  }
  func.func @transform_6(%arg0: i32) -> (i32, i32) {
    %c0_i32 = arith.constant 0 : i32
    %c0_i32_0 = arith.constant 0 : i32
    %c0_i32_1 = arith.constant 0 : i32
    return %c0_i32, %c0_i32_0 : i32, i32
  }
  func.func @transform_7(%arg0: i32) -> (i32, i32) {
    %c0_i32 = arith.constant 0 : i32
    %c0_i32_0 = arith.constant 0 : i32
    %c0_i32_1 = arith.constant 0 : i32
    return %c0_i32, %c0_i32_0 : i32, i32
  }
  func.func @transform_8(%arg0: i32) -> (i32, i32, i32) {
    %c0_i32 = arith.constant 0 : i32
    %c0_i32_0 = arith.constant 0 : i32
    %c0_i32_1 = arith.constant 0 : i32
    %c0_i32_2 = arith.constant 0 : i32
    return %c0_i32, %c0_i32_0, %c0_i32_1 : i32, i32, i32
  }
  func.func @transform_9(%arg0: i32) -> (i32, i32) {
    %c0_i32 = arith.constant 0 : i32
    %c0_i32_0 = arith.constant 0 : i32
    %c0_i32_1 = arith.constant 0 : i32
    return %c0_i32, %c0_i32_0 : i32, i32
  }
  func.func @transform_10(%arg0: i32) -> (i32, i32) {
    %c0_i32 = arith.constant 0 : i32
    %c0_i32_0 = arith.constant 0 : i32
    %c0_i32_1 = arith.constant 0 : i32
    return %c0_i32, %c0_i32_0 : i32, i32
  }
  func.func @transform_11(%arg0: i32) -> (i32, i32) {
    %c0_i32 = arith.constant 0 : i32
    %c0_i32_0 = arith.constant 0 : i32
    %c0_i32_1 = arith.constant 0 : i32
    return %c0_i32, %c0_i32_0 : i32, i32
  }
  func.func @transform_12(%arg0: i32) -> (i32, i32) {
    %c0_i32 = arith.constant 0 : i32
    %c0_i32_0 = arith.constant 0 : i32
    return %arg0, %c0_i32 : i32, i32
  }
}

</mosaic_0001>

<bundles_post_ra>
// kernel: mnist_cnn_forward.1
= control target key start
LH: loop header
LB: loop body
LE: loop exit
PB: predicated region body
PF: predicated region fallthrough
CT: control target
= control target key end

     0   :  { %s5497_s0 = inlined_call_operand.vmem [shape: bf16[512,128], index: 0, kind: input, shape index: {}]   ;;  %s5498_s1 = inlined_call_operand.vmem [shape: bf16[384,256], index: 1, kind: input, shape index: {}]   ;;  %s5499_s2 = inlined_call_operand.vmem [shape: bf16[3,128,256], index: 2, kind: input, shape index: {}]   ;;  %s5500_s3 = inlined_call_operand.vmem [shape: f32[1,256], index: 3, kind: input, shape index: {}]   ;;  %s5501_s4 = inlined_call_operand.vmem [shape: bf16[192,128], index: 4, kind: input, shape index: {}]   ;;  %s5502_s5 = inlined_call_operand.vmem [shape: bf16[3,256,128], index: 5, kind: input, shape index: {}]   ;;  %s5503_s6 = inlined_call_operand.vmem [shape: f32[1,128], index: 6, kind: input, shape index: {}]   ;;  %s5504_s7 = inlined_call_operand.vmem [shape: bf16[96,64], index: 7, kind: input, shape index: {}]   ;;  %s5505_s8 = inlined_call_operand.vmem [shape: bf16[3,128,40], index: 8, kind: input, shape index: {}]   ;;  %s5506_s9 = inlined_call_operand.vmem [shape: f32[1,40], index: 9, kind: input, shape index: {}]   ;;  %s5507_s10 = inlined_call_operand.vmem [shape: bf16[8,32], index: 10, kind: input, shape index: {}]   ;;  %s5508_s11 = inlined_call_operand.vmem [shape: bf16[40,10], index: 11, kind: input, shape index: {}]   ;;  %s5509_s12 = inlined_call_operand.hbm [shape: f32[16,10], index: 12, kind: output, shape index: {}]  }
   0x1   :  { %5510 = sst [smem:[#allocation5_spill]] %s5497_s0 }
   0x2   :  { %17 = vsyncpa [#allocation3], 0 }
   0x3   :  { %19 = vsyncpa [#allocation3 + $0x1], 0  ;;  %s4540_s21 = smov 0   ;;  %s4542_s22 = smov 0  }
   0x4   :  { %s4544_s23 = smov 0   ;;  %s4546_s24 = smov 0  }
   0x5 LB: > { %s4561_s25 = sadd.s32 4294967295, %s4469_s24   ;;  %s3421_s26 = sadd.s32 4294967294, %s4469_s24   ;;  %s4469_s24 = sphi %s4546_s24, %s5517_s24   ;;  %s4465_s23 = sphi %s4544_s23, %s5516_s23   ;;  %s4461_s22 = sphi %s4542_s22, %s5515_s22   ;;  %s4457_s21 = sphi %s4540_s21, %s5514_s21  }
   0x6   : > { %s4565_s27 = sadd.s32 1, %s4469_s24   ;;  %s289_s28 = sadd.s32 1, %s4465_s23 }
   0x7   : > { %s286_s29 = ssub.s32 %s4469_s24, %s4565_s27  ;;  %p299_p0 = scmp.ne.s32.totalorder %s4465_s23, %s4461_s22 }
   0x8   : > { %p287_p1 = scmp.eq.s32.totalorder %s286_s29, 0  ;;  %p300_p2 = scmp.eq.s32.totalorder %s4561_s25, 1 }
   0x9   : > { %p305_p3 = scmp.ne.s32.totalorder %s4461_s22, %s4457_s21  ;;  %p306_p4 = scmp.eq.s32.totalorder %s3421_s26, 1 }
   0xa   : > { %s4576_s30 = scalar_select %p287_p1, %s4465_s23, %s289_s28  }
   0xb   : > { %p4578_p5 = por %p300_p2, %p299_p0  ;;  %p4582_p6 = por %p306_p4, %p305_p3 }
   0xc   : > { %p3424_p7 = scmp.ge.s32.totalorder %s4469_s24, 1  ;;  %p366_p8 = scmp.lt.s32.totalorder %s4469_s24, 3 }
   0xe   : > { %p367_p9 = pnand %p3424_p7, %p366_p8 }
   0xf   : > { %s3426_s15 = sshll.u32 (!%p367_p9), %s4561_s25, 5  ;;  %v4471_v0 = vmov (!%p367_p9), 0   ;;  %v4172_v1 = vld [vmem:[%s5498_s1 + $0x4] ss:$8 sps:$4 sm:$0xff] (!%p367_p9)   ;;  %s5513_s0 = sld [smem:[#allocation5_spill]] (!%p367_p9)  ;;  %vm2764_vm0 = vcmask (!%p367_p9), 523264  }
  0x10   : > { %370 = sbr.rel (%p367_p9) target bundleno = 2267 (0x8db), region = 68  ;;  %831 = vmatprep.subr.bf16.mxu0 (!%p367_p9), %v4471_v0  ;;  %p409_p10 = scmp.lt.s32.totalorder (!%p367_p9), %s3426_s15, 63  ;;  %1217 = vmatprep.mubr.bf16.mxu1 (!%p367_p9), %v4471_v0  ;;  %v4170_v18 = vld [vmem:[%s5498_s1] ss:$8 sps:$4 sm:$0xff] (!%p367_p9)   ;;  %v4173_v19 = vld [vmem:[%s5498_s1 + $0x14] ss:$8 sps:$4 sm:$0xff] (!%p367_p9)  }
  0x11   : > { %863 = vmatprep.mubr.bf16.mxu0 (!%p367_p9), %v4172_v1  ;;  %v4175_v20 = vld [vmem:[%s5498_s1 + $0x10] ss:$8 sps:$4 sm:$0xff] (!%p367_p9)   ;;  %v4176_v21 = vld [vmem:[%s5498_s1 + $0x24] ss:$8 sps:$4 sm:$0xff] (!%p367_p9)   ;;  %v4178_v22 = vld [vmem:[%s5498_s1 + $0x20] ss:$8 sps:$4 sm:$0xff] (!%p367_p9)  }
  0x12   : > { %v4179_v23 = vld [vmem:[%s5498_s1 + $0x34] ss:$8 sps:$4 sm:$0xff] (!%p367_p9)   ;;  %v4181_v24 = vld [vmem:[%s5498_s1 + $0x30] ss:$8 sps:$4 sm:$0xff] (!%p367_p9)   ;;  %v4182_v25 = vld [vmem:[%s5498_s1 + $0x44] ss:$8 sps:$4 sm:$0xff] (!%p367_p9)  }
  0x13   : > { %v4184_v26 = vld [vmem:[%s5498_s1 + $0x40] ss:$8 sps:$4 sm:$0xff] (!%p367_p9)   ;;  %v4185_v27 = vld [vmem:[%s5498_s1 + $0x54] ss:$8 sps:$4 sm:$0xff] (!%p367_p9)   ;;  %v4187_v28 = vld [vmem:[%s5498_s1 + $0x50] ss:$8 sps:$4 sm:$0xff] (!%p367_p9)  }
  0x14   : > { %v4188_v29 = vld [vmem:[%s5498_s1 + $0x64] ss:$8 sps:$4 sm:$0xff] (!%p367_p9)   ;;  %v4190_v30 = vld [vmem:[%s5498_s1 + $0x60] ss:$8 sps:$4 sm:$0xff] (!%p367_p9)   ;;  %v4191_v31 = vld [vmem:[%s5498_s1 + $0x74] ss:$8 sps:$4 sm:$0xff] (!%p367_p9)  }
  0x15   : > { %v4193_v32 = vld [vmem:[%s5498_s1 + $0x70] ss:$8 sps:$4 sm:$0xff] (!%p367_p9)   ;;  %v4194_v33 = vld [vmem:[%s5498_s1 + $0x84] ss:$8 sps:$4 sm:$0xff] (!%p367_p9)   ;;  %v4196_v34 = vld [vmem:[%s5498_s1 + $0x80] ss:$8 sps:$4 sm:$0xff] (!%p367_p9)  }
  0x16   : > { %v4197_v35 = vld [vmem:[%s5498_s1 + $0x94] ss:$8 sps:$4 sm:$0xff] (!%p367_p9)   ;;  %v4199_v36 = vld [vmem:[%s5498_s1 + $0x90] ss:$8 sps:$4 sm:$0xff] (!%p367_p9)   ;;  %v4200_v37 = vld [vmem:[%s5498_s1 + $0xa4] ss:$8 sps:$4 sm:$0xff] (!%p367_p9)  }
  0x17   : > { %s5519_s15 = smov (!%p409_p10, %s3426_s15), 63  ;;  %v4202_v38 = vld [vmem:[%s5498_s1 + $0xa0] ss:$8 sps:$4 sm:$0xff]   ;;  %v4203_v39 = vld [vmem:[%s5498_s1 + $0xb4] ss:$8 sps:$4 sm:$0xff]   ;;  %vm4473_vm1 = vmmov 0  }
  0x18   : > { %s3427_s18 = sshll.u32 %s5519_s15, 2  ;;  %v4205_v40 = vld [vmem:[%s5498_s1 + $0xb0] ss:$8 sps:$4 sm:$0xff]   ;;  %v4206_v41 = vld [vmem:[%s5498_s1 + $0xc4] ss:$8 sps:$4 sm:$0xff]   ;;  %vm3233_vm2 = vcmask 261120  }
  0x19   : > { %s4597_s26 = scalar_lea.vmem %s5513_s0, %s3427_s18  ;;  %v4208_v42 = vld [vmem:[%s5498_s1 + $0xc0] ss:$8 sps:$4 sm:$0xff]   ;;  %v4209_v43 = vld [vmem:[%s5498_s1 + $0xd4] ss:$8 sps:$4 sm:$0xff]   ;;  %v4211_v44 = vld [vmem:[%s5498_s1 + $0xd0] ss:$8 sps:$4 sm:$0xff]  }
  0x1a   : > { %v4154_v2 = vld [vmem:[%s4597_s26] sm:$0xff]   ;;  %v4155_v3 = vld [vmem:[%s4597_s26 + $0x8] sm:$0xff]   ;;  %v4156_v4 = vld [vmem:[%s4597_s26 + $0x10] sm:$0xff]   ;;  %vm3302_vm3 = vcmask 1043456   ;;  %vm3298_vm4 = vcmask 326656   ;;  %s405_s17 = sand.u32 1, %s4461_s22  }
  0x1b   : > { %832 = vmatpush1.bf16.msra.mxu0 %v4154_v2  ;;  %v4157_v5 = vld [vmem:[%s4597_s26 + $0x18] sm:$0xff]   ;;  %v4158_v6 = vld [vmem:[%s4597_s26 + $0x20] sm:$0xff]   ;;  %v4159_v7 = vld [vmem:[%s4597_s26 + $0x28] sm:$0xff]   ;;  %s3425_s18 = sshll.u32 %s405_s17, 3  ;;  %s3772_s19 = sshll.u32 %s4561_s25, 7  ;;  %vm3346_vm5 = vcmask 80896  }
  0x1c   : > { %833 = vmatprep.subr.bf16.mxu0 %v4471_v0  ;;  %v4160_v8 = vld [vmem:[%s4597_s26 + $0x30] sm:$0xff]   ;;  %v4161_v9 = vld [vmem:[%s4597_s26 + $0x38] sm:$0xff]   ;;  %v4162_v10 = vld [vmem:[%s4597_s26 + $0x40] sm:$0xff]   ;;  %s407_s20 = scalar_lea.vmem [#allocation2], %s3425_s18  ;;  %s5455_s15 = scalar_lea.hbm %s5509_s12, %s3772_s19 }
  0x1d   : > { %v4163_v11 = vld [vmem:[%s4597_s26 + $0x48] sm:$0xff]   ;;  %v4164_v12 = vld [vmem:[%s4597_s26 + $0x50] sm:$0xff]   ;;  %v4165_v13 = vld [vmem:[%s4597_s26 + $0x58] sm:$0xff]   ;;  %s3349_s0 = scalar_lea.sflag [#allocation3], %s405_s17  ;;  %s4474_s25 = smov [#allocation2]  }
  0x1e   : > { %v4166_v14 = vld [vmem:[%s4597_s26 + $0x60] sm:$0xff]   ;;  %v4167_v15 = vld [vmem:[%s4597_s26 + $0x68] sm:$0xff]   ;;  %v4168_v16 = vld [vmem:[%s4597_s26 + $0x70] sm:$0xff]   ;;  %s4411_s18 = sshll.u32 %s4474_s25, 4  ;;  %s4412_s18 = int_to_ptr.vmem [resolvable:$false] %s4411_s18 }
  0x1f   : > { %834 = vmatpush1.bf16.msra.mxu0 %v4155_v3  ;;  %v4169_v17 = vld [vmem:[%s4597_s26 + $0x78] sm:$0xff]   ;;  %v4212_v45 = vld [vmem:[%s5498_s1 + $0xe4] ss:$8 sps:$4 sm:$0xff]   ;;  %v4214_v46 = vld [vmem:[%s5498_s1 + $0xe0] ss:$8 sps:$4 sm:$0xff]   ;;  %s3362_s26 = sshll.u32 %s407_s20, 4  ;;  %s5457_s26 = int_to_ptr.vmem [resolvable:$true] %s3362_s26 }
  0x20   : > { %835 = vmatprep.subr.bf16.mxu0 %v4471_v0  ;;  %v4215_v47 = vld [vmem:[%s5498_s1 + $0xf4] ss:$8 sps:$4 sm:$0xff]   ;;  %v4217_v48 = vld [vmem:[%s5498_s1 + $0xf0] ss:$8 sps:$4 sm:$0xff]   ;;  %v4218_v49 = vld [vmem:[%s5498_s1 + $0x104] ss:$8 sps:$4 sm:$0xff]   ;;  %p4414_p0 = scmp.lt.s32.totalorder %s5457_s26, %s4412_s18 }
  0x21   : > { %v4242_v50 = vld [vmem:[%s5499_s2 + $0x84] ss:$8 sps:$4 sm:$0xff]   ;;  %v4244_v51 = vld [vmem:[%s5499_s2 + $0x80] ss:$8 sps:$4 sm:$0xff]   ;;  %v4245_v52 = vld [vmem:[%s5499_s2 + $0x94] ss:$8 sps:$4 sm:$0xff]  }
  0x22   : > { %1185 = vmatprep.subr.bf16.mxu1 %v4242_v50  ;;  %v4247_v53 = vld [vmem:[%s5499_s2 + $0x90] ss:$8 sps:$4 sm:$0xff]   ;;  %v4220_v54 = vld [vmem:[%s5498_s1 + $0x100] ss:$8 sps:$4 sm:$0xff]   ;;  %v4221_v55 = vld [vmem:[%s5498_s1 + $0x114] ss:$8 sps:$4 sm:$0xff]  }
  0x23   : > { %836 = vmatpush1.bf16.msra.mxu0 %v4156_v4  ;;  %1186 = vmatpush1.bf16.msra.mxu1 %v4244_v51  ;;  %v4248_v56 = vld [vmem:[%s5499_s2 + $0xa4] ss:$8 sps:$4 sm:$0xff]   ;;  %v4250_v57 = vld [vmem:[%s5499_s2 + $0xa0] ss:$8 sps:$4 sm:$0xff]   ;;  %v4251_v58 = vld [vmem:[%s5499_s2 + $0xb4] ss:$8 sps:$4 sm:$0xff]  }
  0x24   : > { %837 = vmatprep.subr.bf16.mxu0 %v4471_v0  ;;  %1187 = vmatprep.subr.bf16.mxu1 %v4245_v52  ;;  %v4253_v59 = vld [vmem:[%s5499_s2 + $0xb0] ss:$8 sps:$4 sm:$0xff]   ;;  %v4224_v61 = vld [vmem:[%s5498_s1 + $0x124] ss:$8 sps:$4 sm:$0xff]   ;;  %v4256_v63 = vld [vmem:[%s5499_s2 + $0xc0] ss:$8 sps:$4 sm:$0xff]  }
  0x25   : > { %v4223_v60 = vld [vmem:[%s5498_s1 + $0x110] ss:$8 sps:$4 sm:$0xff]   ;;  %v4254_v62 = vld [vmem:[%s5499_s2 + $0xc4] ss:$8 sps:$4 sm:$0xff]   ;;  %v4257_v1 = vld [vmem:[%s5499_s2 + $0xd4] ss:$8 sps:$4 sm:$0xff]  }
  0x26   : > { %v4259_v2 = vld [vmem:[%s5499_s2 + $0xd0] ss:$8 sps:$4 sm:$0xff]   ;;  %v4226_v3 = vld [vmem:[%s5498_s1 + $0x120] ss:$8 sps:$4 sm:$0xff]   ;;  %v4227_v4 = vld [vmem:[%s5498_s1 + $0x134] ss:$8 sps:$4 sm:$0xff]  }
  0x27   : > { %838 = vmatpush1.bf16.msra.mxu0 %v4157_v5  ;;  %1188 = vmatpush1.bf16.msra.mxu1 %v4247_v53  ;;  %v4260_v5 = vld [vmem:[%s5499_s2 + $0xe4] ss:$8 sps:$4 sm:$0xff]   ;;  %s4407_s16 = scalar_lea.vmem %s5457_s26, 128  ;;  %s4413_s19 = scalar_lea.vmem %s4412_s18, 256 }
  0x28   : > { %839 = vmatprep.subr.bf16.mxu0 %v4471_v0  ;;  %1189 = vmatprep.subr.bf16.mxu1 %v4248_v56  ;;  %p4408_p11 = scmp.ne.s32.totalorder %s5457_s26, %s4407_s16  ;;  %p4415_p1 = scmp.lt.s32.totalorder %s4413_s19, %s4407_s16 }
  0x2a   : > { %p4409_p12 = pnand %p4408_p11, %p4578_p5  ;;  %p4416_p2 = por %p4415_p1, %p4414_p0 }
  0x2b   : > { %840 = vmatpush1.bf16.msra.mxu0 %v4158_v6  ;;  %1190 = vmatpush1.bf16.msra.mxu1 %v4250_v57  ;;  %v4262_v6 = vld [vmem:[%s5499_s2 + $0xe0] ss:$8 sps:$4 sm:$0xff]  }
  0x2c   : > { %841 = vmatprep.subr.bf16.mxu0 %v4471_v0  ;;  %1191 = vmatprep.subr.bf16.mxu1 %v4251_v58  ;;  %p4410_p13 = pneg %p4409_p12 }
  0x2e   : > { %p4417_p3 = pnand %p4416_p2, %p4410_p13 }
  0x2f   : > { %842 = vmatpush1.bf16.msra.mxu0 %v4159_v7  ;;  %1192 = vmatpush1.bf16.msra.mxu1 %v4253_v59  ;;  %v4263_v7 = vld [vmem:[%s5499_s2 + $0xf4] ss:$8 sps:$4 sm:$0xff]  }
  0x30   : > { %843 = vmatprep.subr.bf16.mxu0 %v4471_v0  ;;  %1193 = vmatprep.subr.bf16.mxu1 %v4254_v62  ;;  %v4266_v62 = vld [vmem:[%s5499_s2] ss:$8 sps:$4 sm:$0xff]  }
  0x33   : > { %844 = vmatpush1.bf16.msra.mxu0 %v4160_v8  ;;  %1194 = vmatpush1.bf16.msra.mxu1 %v4256_v63  ;;  %v4265_v8 = vld [vmem:[%s5499_s2 + $0xf0] ss:$8 sps:$4 sm:$0xff]  }
  0x34   : > { %845 = vmatprep.subr.bf16.mxu0 %v4471_v0  ;;  %1195 = vmatprep.subr.bf16.mxu1 %v4257_v1 }
  0x37   : > { %846 = vmatpush1.bf16.msra.mxu0 %v4161_v9  ;;  %1196 = vmatpush1.bf16.msra.mxu1 %v4259_v2  ;;  %v4229_v9 = vld [vmem:[%s5498_s1 + $0x130] ss:$8 sps:$4 sm:$0xff]   ;;  %v4271_v2 = vld [vmem:[%s5499_s2 + $0x14] ss:$8 sps:$4 sm:$0xff]  }
  0x38   : > { %847 = vmatprep.subr.bf16.mxu0 %v4471_v0  ;;  %1197 = vmatprep.subr.bf16.mxu1 %v4260_v5 }
  0x3b   : > { %848 = vmatpush1.bf16.msra.mxu0 %v4162_v10  ;;  %1198 = vmatpush1.bf16.msra.mxu1 %v4262_v6  ;;  %v4230_v10 = vld [vmem:[%s5498_s1 + $0x144] ss:$8 sps:$4 sm:$0xff]  }
  0x3c   : > { %849 = vmatprep.subr.bf16.mxu0 %v4471_v0  ;;  %1199 = vmatprep.subr.bf16.mxu1 %v4263_v7 }
  0x3f   : > { %850 = vmatpush1.bf16.msra.mxu0 %v4163_v11  ;;  %1200 = vmatpush1.bf16.msra.mxu1 %v4265_v8  ;;  %v4232_v11 = vld [vmem:[%s5498_s1 + $0x140] ss:$8 sps:$4 sm:$0xff]  }
  0x40   : > { %851 = vmatprep.subr.bf16.mxu0 %v4471_v0  ;;  %v4272_v8 = vld [vmem:[%s5499_s2 + $0x20] ss:$8 sps:$4 sm:$0xff]  }
  0x43   : > { %852 = vmatpush1.bf16.msra.mxu0 %v4164_v12  ;;  %v4233_v12 = vld [vmem:[%s5498_s1 + $0x154] ss:$8 sps:$4 sm:$0xff]  }
  0x44   : > { %853 = vmatprep.subr.bf16.mxu0 %v4471_v0 }
  0x47   : > { %854 = vmatpush1.bf16.msra.mxu0 %v4165_v13  ;;  %v4235_v13 = vld [vmem:[%s5498_s1 + $0x150] ss:$8 sps:$4 sm:$0xff]  }
  0x48   : > { %855 = vmatprep.subr.bf16.mxu0 %v4471_v0 }
  0x4b   : > { %856 = vmatpush1.bf16.msra.mxu0 %v4166_v14  ;;  %v4236_v14 = vld [vmem:[%s5498_s1 + $0x164] ss:$8 sps:$4 sm:$0xff]  }
  0x4c   : > { %857 = vmatprep.subr.bf16.mxu0 %v4471_v0 }
  0x4f   : > { %858 = vmatpush1.bf16.msra.mxu0 %v4167_v15  ;;  %v4238_v15 = vld [vmem:[%s5498_s1 + $0x160] ss:$8 sps:$4 sm:$0xff]  }
  0x50   : > { %859 = vmatprep.subr.bf16.mxu0 %v4471_v0 }
  0x53   : > { %860 = vmatpush1.bf16.msra.mxu0 %v4168_v16  ;;  %v4239_v16 = vld [vmem:[%s5498_s1 + $0x174] ss:$8 sps:$4 sm:$0xff]  }
  0x54   : > { %861 = vmatprep.subr.bf16.mxu0 %v4471_v0 }
  0x57   : > { %862 = vmatpush1.bf16.msra.mxu0 %v4169_v17  ;;  %v4241_v17 = vld [vmem:[%s5498_s1 + $0x170] ss:$8 sps:$4 sm:$0xff]  }
  0x5a   : > { %864 = vmatmul.mubr.bf16.vlgmr.msra.gmra.mrb[0].mxu0 %v4170_v18  ;;  %v4268_v18 = vld [vmem:[%s5499_s2 + $0x4] ss:$8 sps:$4 sm:$0xff]  }
  0x5b   : > { %871 = vmatprep.mubr.bf16.mxu0 %v4173_v19  ;;  %1378 = vmatprep.subr.bf16.mxu1 %v4268_v18 }
  0x62   : > { %872 = vmatmul.mubr.bf16.gmra.mrb[4].mxu0 %v4175_v20 }
  0x63   : > { %879 = vmatprep.mubr.bf16.mxu0 %v4176_v21 }
  0x6a   : > { %880 = vmatmul.mubr.bf16.gmra.mrb[8].mxu0 %v4178_v22 }
  0x6b   : > { %887 = vmatprep.mubr.bf16.mxu0 %v4179_v23 }
  0x72   : > { %888 = vmatmul.mubr.bf16.gmra.mrb[12].mxu0 %v4181_v24 }
  0x73   : > { %895 = vmatprep.mubr.bf16.mxu0 %v4182_v25 }
  0x7a   : > { %896 = vmatmul.mubr.bf16.gmra.mrb[16].mxu0 %v4184_v26 }
  0x7b   : > { %903 = vmatprep.mubr.bf16.mxu0 %v4185_v27 }
  0x82   : > { %904 = vmatmul.mubr.bf16.gmra.mrb[20].mxu0 %v4187_v28 }
  0x83   : > { %911 = vmatprep.mubr.bf16.mxu0 %v4188_v29 }
  0x8a   : > { %912 = vmatmul.mubr.bf16.gmra.mrb[24].mxu0 %v4190_v30 }
  0x8b   : > { %919 = vmatprep.mubr.bf16.mxu0 %v4191_v31 }
  0x92   : > { %920 = vmatmul.mubr.bf16.gmra.mrb[28].mxu0 %v4193_v32 }
  0x93   : > { %927 = vmatprep.mubr.bf16.mxu0 %v4194_v33 }
  0x9a   : > { %928 = vmatmul.mubr.bf16.gmra.mrb[32].mxu0 %v4196_v34 }
  0x9b   : > { %935 = vmatprep.mubr.bf16.mxu0 %v4197_v35 }
  0xa2   : > { %936 = vmatmul.mubr.bf16.gmra.mrb[36].mxu0 %v4199_v36 }
  0xa3   : > { %943 = vmatprep.mubr.bf16.mxu0 %v4200_v37 }
  0xaa   : > { %944 = vmatmul.mubr.bf16.gmra.mrb[40].mxu0 %v4202_v38 }
  0xab   : > { %951 = vmatprep.mubr.bf16.mxu0 %v4203_v39 }
  0xb2   : > { %952 = vmatmul.mubr.bf16.gmra.mrb[44].mxu0 %v4205_v40 }
  0xb3   : > { %959 = vmatprep.mubr.bf16.mxu0 %v4206_v41 }
  0xba   : > { %960 = vmatmul.mubr.bf16.gmra.mrb[48].mxu0 %v4208_v42 }
  0xbb   : > { %967 = vmatprep.mubr.bf16.mxu0 %v4209_v43 }
  0xc2   : > { %968 = vmatmul.mubr.bf16.gmra.mrb[52].mxu0 %v4211_v44 }
  0xc3   : > { %975 = vmatprep.mubr.bf16.mxu0 %v4212_v45 }
  0xca   : > { %976 = vmatmul.mubr.bf16.gmra.mrb[56].mxu0 %v4214_v46 }
  0xcb   : > { %983 = vmatprep.mubr.bf16.mxu0 %v4215_v47 }
  0xd2   : > { %984 = vmatmul.mubr.bf16.gmra.mrb[60].mxu0 %v4217_v48 }
  0xd3   : > { %991 = vmatprep.mubr.bf16.mxu0 %v4218_v49 }
  0xda   : > { %992 = vmatmul.mubr.bf16.gmra.mrb[64].mxu0 %v4220_v54 }
  0xdb   : > { %999 = vmatprep.mubr.bf16.mxu0 %v4221_v55 }
  0xe2   : > { %1000 = vmatmul.mubr.bf16.gmra.mrb[68].mxu0 %v4223_v60 }
  0xe3   : > { %1007 = vmatprep.mubr.bf16.mxu0 %v4224_v61 }
  0xea   : > { %1008 = vmatmul.mubr.bf16.gmra.mrb[72].mxu0 %v4226_v3  ;;  %v4269_v3 = vld [vmem:[%s5499_s2 + $0x10] ss:$8 sps:$4 sm:$0xff]  }
  0xeb   : > { %1015 = vmatprep.mubr.bf16.mxu0 %v4227_v4  ;;  %v4274_v4 = vld [vmem:[%s5499_s2 + $0x24] ss:$8 sps:$4 sm:$0xff]  }
  0xf2   : > { %1016 = vmatmul.mubr.bf16.gmra.mrb[76].mxu0 %v4229_v9 }
  0xf3   : > { %1023 = vmatprep.mubr.bf16.mxu0 %v4230_v10 }
  0xfa   : > { %1024 = vmatmul.mubr.bf16.gmra.mrb[80].mxu0 %v4232_v11  ;;  %v4277_v11 = vld [vmem:[%s5499_s2 + $0x34] ss:$8 sps:$4 sm:$0xff]  }
  0xfb   : > { %1031 = vmatprep.mubr.bf16.mxu0 %v4233_v12  ;;  %v4275_v12 = vld [vmem:[%s5499_s2 + $0x30] ss:$8 sps:$4 sm:$0xff]  }
 0x102   : > { %1032 = vmatmul.mubr.bf16.gmra.mrb[84].mxu0 %v4235_v13  ;;  %v4280_v13 = vld [vmem:[%s5499_s2 + $0x44] ss:$8 sps:$4 sm:$0xff]  }
 0x103   : > { %1039 = vmatprep.mubr.bf16.mxu0 %v4236_v14 }
 0x10a   : > { %1040 = vmatmul.mubr.bf16.gmra.mrb[88].mxu0 %v4238_v15 }
 0x10b   : > { %1047 = vmatprep.mubr.bf16.mxu0 %v4239_v16 }
 0x112   : > { %1048 = vmatmul.mubr.bf16.gmra.mrb[92].mxu0 %v4241_v17  ;;  %v4278_v17 = vld [vmem:[%s5499_s2 + $0x40] ss:$8 sps:$4 sm:$0xff]  }
 0x12d   : > { %v4822_v19 = vpop.f32.mrb[0].mxu0 }
 0x12e   : > { %v867_v20 = vpop.f32.mrb[1].mxu0 }
 0x12f   : > { %v4824_v21 = vpop.f32.mrb[2].mxu0 }
 0x130   : > { %v1056_v22 = vpack.c.bf16 %v4824_v21, %v4822_v19  ;;  %v870_v23 = vpop.f32.mrb[3].mxu0  ;;  %v4296_v19 = vld [vmem:[%s5499_s2 + $0x120] ss:$8 sps:$4 sm:$0xff]  }
 0x131   : > { %v4283_v23 = vld [vmem:[%s5499_s2 + $0x54] ss:$8 sps:$4 sm:$0xff]  }
 0x135   : > { %v4828_v24 = vpop.f32.mrb[4].mxu0 }
 0x136   : > { %v875_v25 = vpop.f32.mrb[5].mxu0 }
 0x137   : > { %v4830_v26 = vpop.f32.mrb[6].mxu0  ;;  %v4281_v25 = vld [vmem:[%s5499_s2 + $0x50] ss:$8 sps:$4 sm:$0xff]  }
 0x138   : > { %v1057_v27 = vpack.c.bf16 %v4830_v26, %v4828_v24  ;;  %v878_v28 = vpop.f32.mrb[7].mxu0  ;;  %v4302_v24 = vld [vmem:[%s5499_s2 + $0x140] ss:$8 sps:$4 sm:$0xff]  }
 0x139   : > { %v4286_v28 = vld [vmem:[%s5499_s2 + $0x64] ss:$8 sps:$4 sm:$0xff]  }
 0x13d   : > { %v4834_v29 = vpop.f32.mrb[8].mxu0 }
 0x13e   : > { %v883_v30 = vpop.f32.mrb[9].mxu0 }
 0x13f   : > { %v4836_v31 = vpop.f32.mrb[10].mxu0 }
 0x140   : > { %v1058_v32 = vpack.c.bf16 %v4836_v31, %v4834_v29  ;;  %v886_v33 = vpop.f32.mrb[11].mxu0  ;;  %v4308_v29 = vld [vmem:[%s5499_s2 + $0x160] ss:$8 sps:$4 sm:$0xff]  }
 0x145   : > { %v4840_v34 = vpop.f32.mrb[12].mxu0 }
 0x146   : > { %v891_v35 = vpop.f32.mrb[13].mxu0 }
 0x147   : > { %v4842_v36 = vpop.f32.mrb[14].mxu0 }
 0x148   : > { %v1059_v37 = vpack.c.bf16 %v4842_v36, %v4840_v34  ;;  %v894_v38 = vpop.f32.mrb[15].mxu0 }
 0x149   : > { %v4284_v38 = vld [vmem:[%s5499_s2 + $0x60] ss:$8 sps:$4 sm:$0xff]  }
 0x14d   : > { %v4846_v39 = vpop.f32.mrb[16].mxu0 }
 0x14e   : > { %v899_v40 = vpop.f32.mrb[17].mxu0 }
 0x14f   : > { %v4848_v41 = vpop.f32.mrb[18].mxu0 }
 0x150   : > { %v1060_v42 = vpack.c.bf16 %v4848_v41, %v4846_v39  ;;  %v902_v43 = vpop.f32.mrb[19].mxu0 }
 0x155   : > { %v4852_v44 = vpop.f32.mrb[20].mxu0 }
 0x156   : > { %v907_v45 = vpop.f32.mrb[21].mxu0 }
 0x157   : > { %v4854_v46 = vpop.f32.mrb[22].mxu0  ;;  %v4289_v45 = vld [vmem:[%s5499_s2 + $0x74] ss:$8 sps:$4 sm:$0xff]  }
 0x158   : > { %v1061_v47 = vpack.c.bf16 %v4854_v46, %v4852_v44  ;;  %v910_v48 = vpop.f32.mrb[23].mxu0  ;;  %v1743_v44 = vlaneseq }
 0x159   : > { %v4287_v48 = vld [vmem:[%s5499_s2 + $0x70] ss:$8 sps:$4 sm:$0xff]  }
 0x15a   : > { %v1744_v46 = vshrl.u32 %v1743_v44, 7  ;;  %v4328_v44 = vld [vmem:[%s5502_s5 + $0xc8] sm:$0xff]  }
 0x15d   : > { %v4858_v49 = vpop.f32.mrb[24].mxu0 }
 0x15e   : > { %v915_v50 = vpop.f32.mrb[25].mxu0 }
 0x15f   : > { %v4860_v51 = vpop.f32.mrb[26].mxu0  ;;  %v4292_v50 = vld [vmem:[%s5499_s2 + $0x104] ss:$8 sps:$4 sm:$0xff]  }
 0x160   : > { %v1062_v52 = vpack.c.bf16 %v4860_v51, %v4858_v49  ;;  %v918_v53 = vpop.f32.mrb[27].mxu0  ;;  %v1741_v49 = vld [vmem:[%s5500_s3] sm:$0x3]  ;;  %v1749_v51 = vsub.s32 1, %v1744_v46 }
 0x165   : > { %v4864_v54 = vpop.f32.mrb[28].mxu0 }
 0x166   : > { %v923_v55 = vpop.f32.mrb[29].mxu0 }
 0x167   : > { %v4866_v56 = vpop.f32.mrb[30].mxu0 }
 0x168   : > { %v1063_v57 = vpack.c.bf16 %v4866_v56, %v4864_v54  ;;  %v926_v58 = vpop.f32.mrb[31].mxu0  ;;  %v5034_v54 = vrot.slane %v1741_v49, %v1749_v51 }
 0x16d   : > { %v929_v59 = vpop.f32.mrb[32].mxu0 }
 0x16e   : > { %v931_v60 = vpop.f32.mrb[33].mxu0 }
 0x16f   : > { %v932_v61 = vpop.f32.mrb[34].mxu0 }
 0x170   : > { %v1080_v63 = vpack.c.bf16 %v932_v61, %v929_v59  ;;  %v934_v1 = vpop.f32.mrb[35].mxu0 }
 0x172   : > { %1218 = vmatmul.mubr.bf16.vlgmr.msra.gmra.mrb[0].mxu1 %v1080_v63 }
 0x173   : > { %1227 = vmatprep.mubr.bf16.mxu1 %v4471_v0  ;;  %1379 = vmatpush1.bf16.msra.mxu1 %v4266_v62 }
 0x174   : > { %1380 = vmatprep.subr.bf16.mxu1 %v4271_v2 }
 0x175   : > { %v937_v5 = vpop.f32.mrb[36].mxu0 }
 0x176   : > { %v939_v6 = vpop.f32.mrb[37].mxu0 }
 0x177   : > { %v940_v7 = vpop.f32.mrb[38].mxu0  ;;  %1381 = vmatpush1.bf16.msra.mxu1 %v4269_v3 }
 0x178   : > { %v1081_v9 = vpack.c.bf16 %v940_v7, %v937_v5  ;;  %v942_v10 = vpop.f32.mrb[39].mxu0  ;;  %1382 = vmatprep.subr.bf16.mxu1 %v4274_v4 }
 0x17a   : > { %1228 = vmatmul.mubr.bf16.gmra.mrb[4].mxu1 %v1081_v9 }
 0x17b   : > { %1237 = vmatprep.mubr.bf16.mxu1 %v4471_v0  ;;  %1383 = vmatpush1.bf16.msra.mxu1 %v4272_v8 }
 0x17c   : > { %1384 = vmatprep.subr.bf16.mxu1 %v4277_v11 }
 0x17d   : > { %v945_v14 = vpop.f32.mrb[40].mxu0 }
 0x17e   : > { %v947_v15 = vpop.f32.mrb[41].mxu0 }
 0x17f   : > { %v948_v16 = vpop.f32.mrb[42].mxu0  ;;  %1385 = vmatpush1.bf16.msra.mxu1 %v4275_v12  ;;  %v4290_v15 = vld [vmem:[%s5499_s2 + $0x100] ss:$8 sps:$4 sm:$0xff]  }
 0x180   : > { %v1082_v18 = vpack.c.bf16 %v948_v16, %v945_v14  ;;  %v950_v20 = vpop.f32.mrb[43].mxu0  ;;  %1386 = vmatprep.subr.bf16.mxu1 %v4280_v13 }
 0x182   : > { %1238 = vmatmul.mubr.bf16.gmra.mrb[8].mxu1 %v1082_v18 }
 0x183   : > { %1247 = vmatprep.mubr.bf16.mxu1 %v4471_v0  ;;  %1387 = vmatpush1.bf16.msra.mxu1 %v4278_v17  ;;  %v4295_v17 = vld [vmem:[%s5499_s2 + $0x114] ss:$8 sps:$4 sm:$0xff]  }
 0x184   : > { %1388 = vmatprep.subr.bf16.mxu1 %v4283_v23  ;;  %v4293_v23 = vld [vmem:[%s5499_s2 + $0x110] ss:$8 sps:$4 sm:$0xff]  }
 0x185   : > { %v953_v30 = vpop.f32.mrb[44].mxu0 }
 0x186   : > { %v955_v33 = vpop.f32.mrb[45].mxu0 }
 0x187   : > { %v956_v35 = vpop.f32.mrb[46].mxu0  ;;  %1389 = vmatpush1.bf16.msra.mxu1 %v4281_v25  ;;  %v4298_v25 = vld [vmem:[%s5499_s2 + $0x124] ss:$8 sps:$4 sm:$0xff]  }
 0x188   : > { %v1083_v40 = vpack.c.bf16 %v956_v35, %v953_v30  ;;  %v958_v43 = vpop.f32.mrb[47].mxu0  ;;  %1390 = vmatprep.subr.bf16.mxu1 %v4286_v28 }
 0x18a   : > { %1248 = vmatmul.mubr.bf16.gmra.mrb[12].mxu1 %v1083_v40  ;;  %v4304_v40 = vld [vmem:[%s5499_s2 + $0x144] ss:$8 sps:$4 sm:$0xff]  }
 0x18b   : > { %1257 = vmatprep.mubr.bf16.mxu1 %v4471_v0  ;;  %1391 = vmatpush1.bf16.msra.mxu1 %v4284_v38  ;;  %v4299_v38 = vld [vmem:[%s5499_s2 + $0x130] ss:$8 sps:$4 sm:$0xff]  }
 0x18c   : > { %1392 = vmatprep.subr.bf16.mxu1 %v4289_v45 }
 0x18d   : > { %v961_v53 = vpop.f32.mrb[48].mxu0 }
 0x18e   : > { %v963_v55 = vpop.f32.mrb[49].mxu0 }
 0x18f   : > { %v964_v58 = vpop.f32.mrb[50].mxu0  ;;  %1393 = vmatpush1.bf16.msra.mxu1 %v4287_v48  ;;  %v4310_v55 = vld [vmem:[%s5499_s2 + $0x164] ss:$8 sps:$4 sm:$0xff]  }
 0x190   : > { %v1084_v59 = vpack.c.bf16 %v964_v58, %v961_v53  ;;  %v966_v60 = vpop.f32.mrb[51].mxu0  ;;  %1596 = vmatprep.subr.bf16.mxu1 %v4292_v50  ;;  %v4305_v53 = vld [vmem:[%s5499_s2 + $0x150] ss:$8 sps:$4 sm:$0xff]  }
 0x192   : > { %1258 = vmatmul.mubr.bf16.gmra.mrb[16].mxu1 %v1084_v59 }
 0x193   : > { %1267 = vmatprep.mubr.bf16.mxu1 %v4471_v0 }
 0x195   : > { %v969_v61 = vpop.f32.mrb[52].mxu0 }
 0x196   : > { %v971_v62 = vpop.f32.mrb[53].mxu0 }
 0x197   : > { %v972_v63 = vpop.f32.mrb[54].mxu0  ;;  %v4311_v62 = vld [vmem:[%s5499_s2 + $0x170] ss:$8 sps:$4 sm:$0xff]  }
 0x198   : > { %v1085_v1 = vpack.c.bf16 %v972_v63, %v969_v61  ;;  %v974_v2 = vpop.f32.mrb[55].mxu0 }
 0x19a   : > { %1268 = vmatmul.mubr.bf16.gmra.mrb[20].mxu1 %v1085_v1 }
 0x19b   : > { %1277 = vmatprep.mubr.bf16.mxu1 %v4471_v0 }
 0x19d   : > { %v977_v3 = vpop.f32.mrb[56].mxu0 }
 0x19e   : > { %v979_v4 = vpop.f32.mrb[57].mxu0 }
 0x19f   : > { %v980_v5 = vpop.f32.mrb[58].mxu0 }
 0x1a0   : > { %v1086_v6 = vpack.c.bf16 %v980_v5, %v977_v3  ;;  %v982_v7 = vpop.f32.mrb[59].mxu0 }
 0x1a2   : > { %1278 = vmatmul.mubr.bf16.gmra.mrb[24].mxu1 %v1086_v6 }
 0x1a3   : > { %1287 = vmatprep.mubr.bf16.mxu1 %v4471_v0 }
 0x1a5   : > { %v985_v8 = vpop.f32.mrb[60].mxu0 }
 0x1a6   : > { %v987_v9 = vpop.f32.mrb[61].mxu0 }
 0x1a7   : > { %v988_v10 = vpop.f32.mrb[62].mxu0 }
 0x1a8   : > { %v1087_v11 = vpack.c.bf16 %v988_v10, %v985_v8  ;;  %v990_v12 = vpop.f32.mrb[63].mxu0 }
 0x1aa   : > { %1288 = vmatmul.mubr.bf16.gmra.mrb[28].mxu1 %v1087_v11 }
 0x1ab   : > { %1410 = vmatprep.mubr.bf16.mxu1 %v4471_v0 }
 0x1ad   : > { %v4926_v13 = vpop.f32.mrb[64].mxu0 }
 0x1ae   : > { %v995_v14 = vpop.f32.mrb[65].mxu0 }
 0x1af   : > { %v4931_v16 = vpop.f32.mrb[66].mxu0 }
 0x1b0   : > { %v1491_v18 = vpack.c.bf16 %v4931_v16, %v4926_v13  ;;  %v998_v20 = vpop.f32.mrb[67].mxu0 }
 0x1b2   : > { %1411 = vmatmul.mubr.bf16.vlgmr.msra.gmra.mrb[0].mxu1 %v1056_v22  ;;  %v4301_v22 = vld [vmem:[%s5499_s2 + $0x134] ss:$8 sps:$4 sm:$0xff]  }
 0x1b3   : > { %1420 = vmatprep.mubr.bf16.mxu1 %v4471_v0  ;;  %1597 = vmatpush1.bf16.msra.mxu1 %v4290_v15 }
 0x1b4   : > { %1598 = vmatprep.subr.bf16.mxu1 %v4295_v17 }
 0x1b5   : > { %v4948_v28 = vpop.f32.mrb[68].mxu0 }
 0x1b6   : > { %v1003_v30 = vpop.f32.mrb[69].mxu0 }
 0x1b7   : > { %1599 = vmatpush1.bf16.msra.mxu1 %v4293_v23  ;;  %v4953_v21 = vpop.f32.mrb[70].mxu0 }
 0x1b8   : > { %1600 = vmatprep.subr.bf16.mxu1 %v4298_v25  ;;  %v1492_v33 = vpack.c.bf16 %v4953_v21, %v4948_v28  ;;  %v1006_v35 = vpop.f32.mrb[71].mxu0 }
 0x1ba   : > { %1421 = vmatmul.mubr.bf16.gmra.mrb[4].mxu1 %v1057_v27  ;;  %v4307_v27 = vld [vmem:[%s5499_s2 + $0x154] ss:$8 sps:$4 sm:$0xff]  }
 0x1bb   : > { %1430 = vmatprep.mubr.bf16.mxu1 %v4471_v0  ;;  %1601 = vmatpush1.bf16.msra.mxu1 %v4296_v19 }
 0x1bc   : > { %1602 = vmatprep.subr.bf16.mxu1 %v4301_v22 }
 0x1bd   : > { %v1009_v43 = vpop.f32.mrb[72].mxu0 }
 0x1be   : > { %v1011_v45 = vpop.f32.mrb[73].mxu0 }
 0x1bf   : > { %1603 = vmatpush1.bf16.msra.mxu1 %v4299_v38  ;;  %v1012_v26 = vpop.f32.mrb[74].mxu0 }
 0x1c0   : > { %1604 = vmatprep.subr.bf16.mxu1 %v4304_v40  ;;  %v1493_v48 = vpack.c.bf16 %v1012_v26, %v1009_v43  ;;  %v1014_v50 = vpop.f32.mrb[75].mxu0 }
 0x1c2   : > { %1431 = vmatmul.mubr.bf16.gmra.mrb[8].mxu1 %v1058_v32  ;;  %v4313_v32 = vld [vmem:[%s5499_s2 + $0x174] ss:$8 sps:$4 sm:$0xff]  }
 0x1c3   : > { %1440 = vmatprep.mubr.bf16.mxu1 %v4471_v0  ;;  %1605 = vmatpush1.bf16.msra.mxu1 %v4302_v24 }
 0x1c4   : > { %1606 = vmatprep.subr.bf16.mxu1 %v4307_v27 }
 0x1c5   : > { %v1017_v58 = vpop.f32.mrb[76].mxu0 }
 0x1c6   : > { %v1019_v59 = vpop.f32.mrb[77].mxu0 }
 0x1c7   : > { %1607 = vmatpush1.bf16.msra.mxu1 %v4305_v53  ;;  %v1020_v31 = vpop.f32.mrb[78].mxu0 }
 0x1c8   : > { %1608 = vmatprep.subr.bf16.mxu1 %v4310_v55  ;;  %v1494_v60 = vpack.c.bf16 %v1020_v31, %v1017_v58  ;;  %v1022_v61 = vpop.f32.mrb[79].mxu0 }
 0x1ca   : > { %1441 = vmatmul.mubr.bf16.gmra.mrb[12].mxu1 %v1059_v37 }
 0x1cb   : > { %1450 = vmatprep.mubr.bf16.mxu1 %v4471_v0  ;;  %1609 = vmatpush1.bf16.msra.mxu1 %v4308_v29 }
 0x1cc   : > { %1610 = vmatprep.subr.bf16.mxu1 %v4313_v32 }
 0x1cd   : > { %v1025_v63 = vpop.f32.mrb[80].mxu0 }
 0x1ce   : > { %v1027_v1 = vpop.f32.mrb[81].mxu0 }
 0x1cf   : > { %1611 = vmatpush1.bf16.msra.mxu1 %v4311_v62  ;;  %v1028_v2 = vpop.f32.mrb[82].mxu0 }
 0x1d0   : > { %v1495_v3 = vpack.c.bf16 %v1028_v2, %v1025_v63  ;;  %v1030_v4 = vpop.f32.mrb[83].mxu0 }
 0x1d2   : > { %1451 = vmatmul.mubr.bf16.gmra.mrb[16].mxu1 %v1060_v42 }
 0x1d3   : > { %1460 = vmatprep.mubr.bf16.mxu1 %v4471_v0 }
 0x1d5   : > { %v1033_v34 = vpop.f32.mrb[84].mxu0 }
 0x1d6   : > { %v1035_v36 = vpop.f32.mrb[85].mxu0 }
 0x1d7   : > { %v1036_v37 = vpop.f32.mrb[86].mxu0 }
 0x1d8   : > { %v1496_v5 = vpack.c.bf16 %v1036_v37, %v1033_v34  ;;  %v1038_v6 = vpop.f32.mrb[87].mxu0 }
 0x1da   : > { %1461 = vmatmul.mubr.bf16.gmra.mrb[20].mxu1 %v1061_v47  ;;  %v1745_v47 = vsub.s32 0, %v1744_v46 }
 0x1db   : > { %1470 = vmatprep.mubr.bf16.mxu1 %v4471_v0 }
 0x1dd   : > { %v1041_v7 = vpop.f32.mrb[88].mxu0 }
 0x1de   : > { %v1043_v8 = vpop.f32.mrb[89].mxu0 }
 0x1df   : > { %v1044_v9 = vpop.f32.mrb[90].mxu0 }
 0x1e0   : > { %v1497_v10 = vpack.c.bf16 %v1044_v9, %v1041_v7  ;;  %v1046_v11 = vpop.f32.mrb[91].mxu0 }
 0x1e2   : > { %1471 = vmatmul.mubr.bf16.gmra.mrb[24].mxu1 %v1062_v52  ;;  %v5032_v52 = vrot.slane %v1741_v49, %v1745_v47 }
 0x1e3   : > { %1480 = vmatprep.mubr.bf16.mxu1 %v4471_v0 }
 0x1e5   : > { %v1049_v39 = vpop.f32.mrb[92].mxu0 }
 0x1e6   : > { %v1051_v41 = vpop.f32.mrb[93].mxu0 }
 0x1e7   : > { %v1052_v42 = vpop.f32.mrb[94].mxu0 }
 0x1e8   : > { %v1498_v12 = vpack.c.bf16 %v1052_v42, %v1049_v39  ;;  %v1054_v14 = vpop.f32.mrb[95].mxu0 }
 0x1e9   : > { %v4327_v14 = vld [vmem:[%s5502_s5 + $0x80] sm:$0xff]  }
 0x1ea   : > { %1481 = vmatmul.mubr.bf16.gmra.mrb[28].mxu1 %v1063_v57 }
 0x1eb   : > { %1628 = vmatprep.mubr.bf16.mxu1 %v4471_v0 }
 0x1f2   : > { %1629 = vmatmul.mubr.bf16.vlgmr.msra.gmra.mrb[0].mxu1 %v1491_v18 }
 0x1f3   : > { %1638 = vmatprep.mubr.bf16.mxu1 %v4471_v0 }
 0x1fa   : > { %1639 = vmatmul.mubr.bf16.gmra.mrb[4].mxu1 %v1492_v33 }
 0x1fb   : > { %1648 = vmatprep.mubr.bf16.mxu1 %v4471_v0 }
 0x202   : > { %1649 = vmatmul.mubr.bf16.gmra.mrb[8].mxu1 %v1493_v48 }
 0x203   : > { %1658 = vmatprep.mubr.bf16.mxu1 %v4471_v0 }
 0x20a   : > { %1659 = vmatmul.mubr.bf16.gmra.mrb[12].mxu1 %v1494_v60 }
 0x20b   : > { %1668 = vmatprep.mubr.bf16.mxu1 %v4471_v0 }
 0x212   : > { %1669 = vmatmul.mubr.bf16.gmra.mrb[16].mxu1 %v1495_v3 }
 0x213   : > { %1678 = vmatprep.mubr.bf16.mxu1 %v4471_v0 }
 0x21a   : > { %1679 = vmatmul.mubr.bf16.gmra.mrb[20].mxu1 %v1496_v5 }
 0x21b   : > { %1688 = vmatprep.mubr.bf16.mxu1 %v4471_v0 }
 0x222   : > { %1689 = vmatmul.mubr.bf16.gmra.mrb[24].mxu1 %v1497_v10 }
 0x223   : > { %1698 = vmatprep.mubr.bf16.mxu1 %v4471_v0 }
 0x22a   : > { %1699 = vmatmul.mubr.bf16.gmra.mrb[28].mxu1 %v1498_v12  ;;  %v4326_v12 = vld [vmem:[%s5502_s5 + $0xc0] sm:$0xff]  }
 0x22b   : > { %1961 = vmatprep.mubr.bf16.mxu1 %v4471_v0  ;;  %3775 = vmatprep.subr.bf16.mxu0 %v4326_v12 }
 0x22c   : > { %3776 = vmatpush3.bf16.msra.mxu0 %v4327_v14 }
 0x22d   : > { %3777 = vmatprep.subr.bf16.mxu0 %v4328_v44 }
 0x2c5   : > { %v1630_v56 = vpop.f32.mrb[0].mxu1 }
 0x2c6   : > { %v1753_v57 = vadd.f32 %v5032_v52, %v1630_v56  ;;  %v1632_v13 = vpop.f32.mrb[1].mxu1 }
 0x2c7   : > { %v1754_v15 = vadd.f32 %v5034_v54, %v1632_v13  ;;  %v1634_v16 = vpop.f32.mrb[2].mxu1 }
 0x2c8   : > { %v1755_v17 = vadd.f32 %v5032_v52, %v1634_v16  ;;  %v1636_v18 = vpop.f32.mrb[3].mxu1  ;;  %v1785_v23 = vmax.f32 %v1753_v57, 0.0  ;;  %v4329_v57 = vld [vmem:[%s5502_s5 + $0x88] sm:$0xff]   ;;  %v4330_v16 = vld [vmem:[%s5502_s5 + $0xd0] sm:$0xff]  }
 0x2c9   : > { %v1756_v20 = vadd.f32 %v5034_v54, %v1636_v18  ;;  %v1786_v28 = vmax.f32 %v1754_v15, 0.0  ;;  %3778 = vmatpush3.bf16.msra.mxu0 %v4329_v57  ;;  %v4319_v57 = vld [vmem:[%s5501_s4 + $0x28] sm:$0xff]  }
 0x2ca   : > { %v1787_v25 = vmax.f32 %v1755_v17, 0.0  ;;  %3779 = vmatprep.subr.bf16.mxu0 %v4330_v16  ;;  %v4322_v16 = vld [vmem:[%s5501_s4 + $0x40] sm:$0xff]  }
 0x2cb   : > { %v1788_v30 = vmax.f32 %v1756_v20, 0.0 }
 0x2cc   : > { %v1817_v19 = vpack.c.bf16 %v1787_v25, %v1785_v23 }
 0x2cd   : > { %v1818_v21 = vpack.c.bf16 %v1788_v30, %v1786_v28  ;;  %v1640_v22 = vpop.f32.mrb[4].mxu1  ;;  %v4331_v28 = vld [vmem:[%s5502_s5 + $0x90] sm:$0xff]  }
 0x2ce   : > { %v1757_v33 = vadd.f32 %v5032_v52, %v1640_v22  ;;  %v1642_v35 = vpop.f32.mrb[5].mxu1  ;;  %3780 = vmatpush3.bf16.msra.mxu0 %v4331_v28  ;;  %v4336_v28 = vld [vmem:[%s5502_s5 + $0xe8] sm:$0xff]  }
 0x2cf   : > { %v1758_v38 = vadd.f32 %v5034_v54, %v1642_v35  ;;  %v1644_v40 = vpop.f32.mrb[6].mxu1  ;;  %1929 = vmatprep.subr.bf16.mxu1 %v1818_v21  ;;  %v4332_v21 = vld [vmem:[%s5502_s5 + $0xd8] sm:$0xff]  }
 0x2d0   : > { %v1759_v43 = vadd.f32 %v5032_v52, %v1644_v40  ;;  %v1646_v45 = vpop.f32.mrb[7].mxu1  ;;  %1930 = vmatpush1.bf16.msra.mxu1 %v1817_v19  ;;  %v1789_v26 = vmax.f32 %v1757_v33, 0.0  ;;  %3781 = vmatprep.subr.bf16.mxu0 %v4332_v21  ;;  %v4340_v21 = vld [vmem:[%s5502_s5 + $0xf8] sm:$0xff]  }
 0x2d1   : > { %v1760_v24 = vadd.f32 %v5034_v54, %v1646_v45  ;;  %v1790_v48 = vmax.f32 %v1758_v38, 0.0 }
 0x2d2   : > { %v1791_v27 = vmax.f32 %v1759_v43, 0.0  ;;  %v4333_v43 = vld [vmem:[%s5502_s5 + $0x98] sm:$0xff]  }
 0x2d3   : > { %v1792_v50 = vmax.f32 %v1760_v24, 0.0  ;;  %3782 = vmatpush3.bf16.msra.mxu0 %v4333_v43 }
 0x2d4   : > { %v1819_v53 = vpack.c.bf16 %v1791_v27, %v1789_v26 }
 0x2d5   : > { %v1820_v55 = vpack.c.bf16 %v1792_v50, %v1790_v48  ;;  %v1650_v58 = vpop.f32.mrb[8].mxu1 }
 0x2d6   : > { %v1761_v59 = vadd.f32 %v5032_v52, %v1650_v58  ;;  %v1652_v29 = vpop.f32.mrb[9].mxu1 }
 0x2d7   : > { %v1762_v31 = vadd.f32 %v5034_v54, %v1652_v29  ;;  %v1654_v32 = vpop.f32.mrb[10].mxu1  ;;  %1931 = vmatprep.subr.bf16.mxu1 %v1820_v55 }
 0x2d8   : > { %v1763_v60 = vadd.f32 %v5032_v52, %v1654_v32  ;;  %v1656_v61 = vpop.f32.mrb[11].mxu1  ;;  %1932 = vmatpush1.bf16.msra.mxu1 %v1819_v53  ;;  %v1793_v63 = vmax.f32 %v1761_v59, 0.0 }
 0x2d9   : > { %v1764_v62 = vadd.f32 %v5034_v54, %v1656_v61  ;;  %v1794_v2 = vmax.f32 %v1762_v31, 0.0 }
 0x2da   : > { %v1795_v1 = vmax.f32 %v1763_v60, 0.0 }
 0x2db   : > { %v1796_v3 = vmax.f32 %v1764_v62, 0.0 }
 0x2dc   : > { %v1821_v4 = vpack.c.bf16 %v1795_v1, %v1793_v63 }
 0x2dd   : > { %v1822_v34 = vpack.c.bf16 %v1796_v3, %v1794_v2  ;;  %v1660_v36 = vpop.f32.mrb[12].mxu1 }
 0x2de   : > { %v1765_v37 = vadd.f32 %v5032_v52, %v1660_v36  ;;  %v1662_v5 = vpop.f32.mrb[13].mxu1 }
 0x2df   : > { %v1766_v6 = vadd.f32 %v5034_v54, %v1662_v5  ;;  %v1664_v7 = vpop.f32.mrb[14].mxu1  ;;  %1933 = vmatprep.subr.bf16.mxu1 %v1822_v34 }
 0x2e0   : > { %v1767_v8 = vadd.f32 %v5032_v52, %v1664_v7  ;;  %v1666_v9 = vpop.f32.mrb[15].mxu1  ;;  %1934 = vmatpush1.bf16.msra.mxu1 %v1821_v4  ;;  %v1797_v11 = vmax.f32 %v1765_v37, 0.0 }
 0x2e1   : > { %v1768_v10 = vadd.f32 %v5034_v54, %v1666_v9  ;;  %v1798_v41 = vmax.f32 %v1766_v6, 0.0 }
 0x2e2   : > { %v1799_v39 = vmax.f32 %v1767_v8, 0.0 }
 0x2e3   : > { %v1800_v42 = vmax.f32 %v1768_v10, 0.0 }
 0x2e4   : > { %v1823_v46 = vpack.c.bf16 %v1799_v39, %v1797_v11 }
 0x2e5   : > { %v1824_v47 = vpack.c.bf16 %v1800_v42, %v1798_v41  ;;  %v1670_v49 = vpop.f32.mrb[16].mxu1 }
 0x2e6   : > { %v1769_v51 = vadd.f32 %v5032_v52, %v1670_v49  ;;  %v1672_v56 = vpop.f32.mrb[17].mxu1  ;;  %v4314_v49 = vld [vmem:[%s5501_s4] sm:$0xff]  }
 0x2e7   : > { %v1770_v13 = vadd.f32 %v5034_v54, %v1672_v56  ;;  %v1674_v15 = vpop.f32.mrb[18].mxu1  ;;  %1935 = vmatprep.subr.bf16.mxu1 %v1824_v47  ;;  %v4318_v56 = vld [vmem:[%s5501_s4 + $0x20] sm:$0xff]  }
 0x2e8   : > { %v1771_v17 = vadd.f32 %v5032_v52, %v1674_v15  ;;  %v1676_v18 = vpop.f32.mrb[19].mxu1  ;;  %1936 = vmatpush1.bf16.msra.mxu1 %v1823_v46  ;;  %v1801_v23 = vmax.f32 %v1769_v51, 0.0  ;;  %v4317_v51 = vld [vmem:[%s5501_s4 + $0x18] sm:$0xff]  }
 0x2e9   : > { %v1772_v20 = vadd.f32 %v5034_v54, %v1676_v18  ;;  %v1802_v30 = vmax.f32 %v1770_v13, 0.0  ;;  %v4320_v13 = vld [vmem:[%s5501_s4 + $0x30] sm:$0xff]   ;;  %v4321_v15 = vld [vmem:[%s5501_s4 + $0x38] sm:$0xff]  }
 0x2ea   : > { %v1803_v25 = vmax.f32 %v1771_v17, 0.0  ;;  %v4323_v17 = vld [vmem:[%s5501_s4 + $0x48] sm:$0xff]   ;;  %v4324_v18 = vld [vmem:[%s5501_s4 + $0x50] sm:$0xff]  }
 0x2eb   : > { %v1804_v19 = vmax.f32 %v1772_v20, 0.0  ;;  %v4325_v20 = vld [vmem:[%s5501_s4 + $0x58] sm:$0xff]  }
 0x2ec   : > { %v1825_v22 = vpack.c.bf16 %v1803_v25, %v1801_v23  ;;  %v4334_v23 = vld [vmem:[%s5502_s5 + $0xe0] sm:$0xff]  }
 0x2ed   : > { %v1826_v33 = vpack.c.bf16 %v1804_v19, %v1802_v30  ;;  %v1680_v35 = vpop.f32.mrb[20].mxu1  ;;  %v4335_v25 = vld [vmem:[%s5502_s5 + $0xa0] sm:$0xff]   ;;  %3783 = vmatprep.subr.bf16.mxu0 %v4334_v23  ;;  %v4338_v30 = vld [vmem:[%s5502_s5 + $0xf0] sm:$0xff]  }
 0x2ee   : > { %v1773_v38 = vadd.f32 %v5032_v52, %v1680_v35  ;;  %v1682_v40 = vpop.f32.mrb[21].mxu1  ;;  %3784 = vmatpush3.bf16.msra.mxu0 %v4335_v25  ;;  %v4339_v19 = vld [vmem:[%s5502_s5 + $0xb0] sm:$0xff]  }
 0x2ef   : > { %v1774_v45 = vadd.f32 %v5034_v54, %v1682_v40  ;;  %v1684_v24 = vpop.f32.mrb[22].mxu1  ;;  %1937 = vmatprep.subr.bf16.mxu1 %v1826_v33  ;;  %3785 = vmatprep.subr.bf16.mxu0 %v4336_v28  ;;  %v4342_v33 = vld [vmem:[%s5502_s5 + $0x40] sm:$0xff]   ;;  %v4354_v23 = vld [vmem:[%s5502_s5 + $0x70] sm:$0xff]  }
 0x2f0   : > { %v1775_v26 = vadd.f32 %v5032_v52, %v1684_v24  ;;  %v1686_v27 = vpop.f32.mrb[23].mxu1  ;;  %1938 = vmatpush1.bf16.msra.mxu1 %v1825_v22  ;;  %v1805_v50 = vmax.f32 %v1773_v38, 0.0  ;;  %v4341_v22 = vld [vmem:[%s5502_s5 + $0xb8] sm:$0xff]  }
 0x2f1   : > { %v1776_v48 = vadd.f32 %v5034_v54, %v1686_v27  ;;  %v1806_v55 = vmax.f32 %v1774_v45, 0.0 }
 0x2f2   : > { %v1807_v53 = vmax.f32 %v1775_v26, 0.0 }
 0x2f3   : > { %v1808_v58 = vmax.f32 %v1776_v48, 0.0 }
 0x2f4   : > { %v1827_v59 = vpack.c.bf16 %v1807_v53, %v1805_v50 }
 0x2f5   : > { %v1828_v29 = vpack.c.bf16 %v1808_v58, %v1806_v55  ;;  %v1690_v31 = vpop.f32.mrb[24].mxu1 }
 0x2f6   : > { %v1777_v32 = vadd.f32 %v5032_v52, %v1690_v31  ;;  %v1692_v60 = vpop.f32.mrb[25].mxu1 }
 0x2f7   : > { %v1778_v61 = vadd.f32 %v5034_v54, %v1692_v60  ;;  %v1694_v62 = vpop.f32.mrb[26].mxu1  ;;  %1939 = vmatprep.subr.bf16.mxu1 %v1828_v29 }
 0x2f8   : > { %v1779_v63 = vadd.f32 %v5032_v52, %v1694_v62  ;;  %v1696_v1 = vpop.f32.mrb[27].mxu1  ;;  %1940 = vmatpush1.bf16.msra.mxu1 %v1827_v59  ;;  %v1809_v3 = vmax.f32 %v1777_v32, 0.0 }
 0x2f9   : > { %v1780_v2 = vadd.f32 %v5034_v54, %v1696_v1  ;;  %v1810_v34 = vmax.f32 %v1778_v61, 0.0 }
 0x2fa   : > { %v1811_v4 = vmax.f32 %v1779_v63, 0.0 }
 0x2fb   : > { %v1812_v36 = vmax.f32 %v1780_v2, 0.0 }
 0x2fc   : > { %v1829_v37 = vpack.c.bf16 %v1811_v4, %v1809_v3 }
 0x2fd   : > { %v1830_v5 = vpack.c.bf16 %v1812_v36, %v1810_v34  ;;  %v1700_v6 = vpop.f32.mrb[28].mxu1 }
 0x2fe   : > { %v1781_v7 = vadd.f32 %v5032_v52, %v1700_v6  ;;  %v1702_v8 = vpop.f32.mrb[29].mxu1 }
 0x2ff   : > { %v1782_v9 = vadd.f32 %v5034_v54, %v1702_v8  ;;  %v1704_v10 = vpop.f32.mrb[30].mxu1  ;;  %1941 = vmatprep.subr.bf16.mxu1 %v1830_v5  ;;  %v4344_v8 = vld [vmem:[%s5502_s5 + $0x48] sm:$0xff]  }
 0x300   : > { %v1783_v11 = vadd.f32 %v5032_v52, %v1704_v10  ;;  %v1706_v39 = vpop.f32.mrb[31].mxu1  ;;  %1942 = vmatpush1.bf16.msra.mxu1 %v1829_v37  ;;  %v1813_v42 = vmax.f32 %v1781_v7, 0.0  ;;  %v4315_v52 = vld [vmem:[%s5501_s4 + $0x8] sm:$0xff]   ;;  %v4343_v7 = vld [vmem:[%s5502_s5] sm:$0xff]  }
 0x301   : > { %v1784_v41 = vadd.f32 %v5034_v54, %v1706_v39  ;;  %v1814_v14 = vmax.f32 %v1782_v9, 0.0  ;;  %v4316_v54 = vld [vmem:[%s5501_s4 + $0x10] sm:$0xff]   ;;  %v4345_v10 = vld [vmem:[%s5502_s5 + $0x8] sm:$0xff]  }
 0x302   : > { %v1815_v12 = vmax.f32 %v1783_v11, 0.0  ;;  %v4346_v39 = vld [vmem:[%s5502_s5 + $0x50] sm:$0xff]  }
 0x303   : > { %v1816_v44 = vmax.f32 %v1784_v41, 0.0 }
 0x304   : > { %v1831_v46 = vpack.c.bf16 %v1815_v12, %v1813_v42 }
 0x305   : > { %v1832_v47 = vpack.c.bf16 %v1816_v44, %v1814_v14  ;;  %v4347_v44 = vld [vmem:[%s5502_s5 + $0x10] sm:$0xff]  }
 0x307   : > { %1943 = vmatprep.subr.bf16.mxu1 %v1832_v47 }
 0x308   : > { %1944 = vmatpush1.bf16.msra.mxu1 %v1831_v46  ;;  %v4348_v46 = vld [vmem:[%s5502_s5 + $0x58] sm:$0xff]  }
 0x30b   : > { %1962 = vmatmul.mubr.bf16.vlgmr.msra.gmra.mrb[32].mxu1 %v4314_v49  ;;  %v4349_v49 = vld [vmem:[%s5502_s5 + $0x18] sm:$0xff]  }
 0x30c   : > { %1971 = vmatprep.mubr.bf16.mxu1 %v4471_v0 }
 0x313   : > { %1972 = vmatmul.mubr.bf16.gmra.mrb[36].mxu1 %v4315_v52 }
 0x314   : > { %1981 = vmatprep.mubr.bf16.mxu1 %v4471_v0 }
 0x31b   : > { %1982 = vmatmul.mubr.bf16.gmra.mrb[40].mxu1 %v4316_v54  ;;  %v4350_v54 = vld [vmem:[%s5502_s5 + $0x60] sm:$0xff]  }
 0x31c   : > { %1991 = vmatprep.mubr.bf16.mxu1 %v4471_v0 }
 0x323   : > { %1992 = vmatmul.mubr.bf16.gmra.mrb[44].mxu1 %v4317_v51 }
 0x324   : > { %2001 = vmatprep.mubr.bf16.mxu1 %v4471_v0 }
 0x32b   : > { %2002 = vmatmul.mubr.bf16.gmra.mrb[48].mxu1 %v4318_v56 }
 0x32c   : > { %2011 = vmatprep.mubr.bf16.mxu1 %v4471_v0 }
 0x333   : > { %2012 = vmatmul.mubr.bf16.gmra.mrb[52].mxu1 %v4319_v57 }
 0x334   : > { %2021 = vmatprep.mubr.bf16.mxu1 %v4471_v0 }
 0x33b   : > { %2022 = vmatmul.mubr.bf16.gmra.mrb[56].mxu1 %v4320_v13 }
 0x33c   : > { %2031 = vmatprep.mubr.bf16.mxu1 %v4471_v0 }
 0x343   : > { %2032 = vmatmul.mubr.bf16.gmra.mrb[60].mxu1 %v4321_v15  ;;  %v4351_v15 = vld [vmem:[%s5502_s5 + $0x20] sm:$0xff]  }
 0x344   : > { %2041 = vmatprep.mubr.bf16.mxu1 %v4471_v0 }
 0x34b   : > { %2042 = vmatmul.mubr.bf16.gmra.mrb[64].mxu1 %v4322_v16  ;;  %v4352_v16 = vld [vmem:[%s5502_s5 + $0x68] sm:$0xff]  }
 0x34c   : > { %2051 = vmatprep.mubr.bf16.mxu1 %v4471_v0 }
 0x353   : > { %2052 = vmatmul.mubr.bf16.gmra.mrb[68].mxu1 %v4323_v17 }
 0x354   : > { %2061 = vmatprep.mubr.bf16.mxu1 %v4471_v0 }
 0x35b   : > { %2062 = vmatmul.mubr.bf16.gmra.mrb[72].mxu1 %v4324_v18  ;;  %v4353_v18 = vld [vmem:[%s5502_s5 + $0x28] sm:$0xff]  }
 0x35c   : > { %2071 = vmatprep.mubr.bf16.mxu1 %v4471_v0  ;;  %v4337_v0 = vld [vmem:[%s5502_s5 + $0xa8] sm:$0xff]  }
 0x35d   : > { %3786 = vmatpush3.bf16.msra.mxu0 %v4337_v0 }
 0x35e   : > { %3787 = vmatprep.subr.bf16.mxu0 %v4338_v30 }
 0x361   : > { %3788 = vmatpush3.bf16.msra.mxu0 %v4339_v19  ;;  %v4355_v19 = vld [vmem:[%s5502_s5 + $0x30] sm:$0xff]  }
 0x362   : > { %3789 = vmatprep.subr.bf16.mxu0 %v4340_v21  ;;  %v4356_v21 = vld [vmem:[%s5502_s5 + $0x78] sm:$0xff]  }
 0x363   : > { %2072 = vmatmul.mubr.bf16.gmra.mrb[76].mxu1 %v4325_v20 }
 0x365   : > { %3790 = vmatpush3.bf16.msra.mxu0 %v4341_v22  ;;  %v4357_v22 = vld [vmem:[%s5502_s5 + $0x38] sm:$0xff]  }
 0x366   : > { %3815 = vmatprep.subr.bf16.mxu0 %v4342_v33 }
 0x3de   : > { %v5166_v35 = vpop.f32.mrb[32].mxu1 }
 0x3df   : > { %v5168_v38 = vpop.f32.mrb[33].mxu1 }
 0x3e0   : > { %v5170_v40 = vpop.f32.mrb[34].mxu1 }
 0x3e1   : > { %v2082_v43 = vpack.c.bf16 %v5170_v40, %v5166_v35  ;;  %v5174_v45 = vpop.f32.mrb[35].mxu1  ;;  %v4363_v40 = vld [vmem:[%s5502_s5 + $0x110] sm:$0xff]  }
 0x3e2   : > { %v2083_v24 = vpack.c.bf16 %v5174_v45, %v5168_v38  ;;  %v4359_v38 = vld [vmem:[%s5502_s5 + $0x100] sm:$0xff]  }
 0x3e6   : > { %v5178_v26 = vpop.f32.mrb[36].mxu1 }
 0x3e7   : > { %v5180_v27 = vpop.f32.mrb[37].mxu1 }
 0x3e8   : > { %v5182_v48 = vpop.f32.mrb[38].mxu1 }
 0x3e9   : > { %v2084_v50 = vpack.c.bf16 %v5182_v48, %v5178_v26  ;;  %v5186_v53 = vpop.f32.mrb[39].mxu1  ;;  %v4367_v48 = vld [vmem:[%s5502_s5 + $0x120] sm:$0xff]  }
 0x3ea   : > { %v2085_v55 = vpack.c.bf16 %v5186_v53, %v5180_v27  ;;  %v4364_v27 = vld [vmem:[%s5502_s5 + $0x158] sm:$0xff]  }
 0x3eb   : > { %v4365_v53 = vld [vmem:[%s5502_s5 + $0x118] sm:$0xff]  }
 0x3ee   : > { %v5190_v58 = vpop.f32.mrb[40].mxu1 }
 0x3ef   : > { %v5192_v59 = vpop.f32.mrb[41].mxu1 }
 0x3f0   : > { %v5194_v29 = vpop.f32.mrb[42].mxu1 }
 0x3f1   : > { %v2086_v31 = vpack.c.bf16 %v5194_v29, %v5190_v58  ;;  %v5198_v32 = vpop.f32.mrb[43].mxu1  ;;  %v4371_v29 = vld [vmem:[%s5502_s5 + $0x130] sm:$0xff]  }
 0x3f2   : > { %v2087_v60 = vpack.c.bf16 %v5198_v32, %v5192_v59  ;;  %v4368_v59 = vld [vmem:[%s5502_s5 + $0x168] sm:$0xff]  }
 0x3f3   : > { %v4369_v32 = vld [vmem:[%s5502_s5 + $0x128] sm:$0xff]  }
 0x3f6   : > { %v5202_v61 = vpop.f32.mrb[44].mxu1 }
 0x3f7   : > { %v5204_v62 = vpop.f32.mrb[45].mxu1 }
 0x3f8   : > { %v5206_v63 = vpop.f32.mrb[46].mxu1 }
 0x3f9   : > { %v2088_v1 = vpack.c.bf16 %v5206_v63, %v5202_v61  ;;  %v5210_v2 = vpop.f32.mrb[47].mxu1  ;;  %v4374_v61 = vld [vmem:[%s5504_s7] sm:$0xff]  }
 0x3fa   : > { %v2089_v3 = vpack.c.bf16 %v5210_v2, %v5204_v62  ;;  %v4372_v62 = vld [vmem:[%s5502_s5 + $0x178] sm:$0xff]   ;;  %3950 = vmatprep.mubr.msk.bf16.mxu1 %vm2764_vm0, %v4374_v61  ;;  %v4380_v63 = vld [vmem:[%s5505_s8] sm:$0xff]  }
 0x3fb   : > { %v4373_v2 = vld [vmem:[%s5502_s5 + $0x138] sm:$0xff]  }
 0x3fe   : > { %v2003_v4 = vpop.f32.mrb[48].mxu1 }
 0x3ff   : > { %v2005_v34 = vpop.f32.mrb[49].mxu1 }
 0x400   : > { %v2007_v36 = vpop.f32.mrb[50].mxu1 }
 0x401   : > { %v2122_v37 = vpack.c.bf16 %v2007_v36, %v2003_v4  ;;  %v2009_v5 = vpop.f32.mrb[51].mxu1  ;;  %v4358_v4 = vld [vmem:[%s5502_s5 + $0x140] sm:$0xff]  }
 0x402   : > { %v2123_v6 = vpack.c.bf16 %v2009_v5, %v2005_v34 }
 0x404   : > { %2291 = vmatprep.mubr.bf16.mxu0 %v2123_v6  ;;  %v4361_v6 = vld [vmem:[%s5502_s5 + $0x108] sm:$0xff]  }
 0x405   : > { %2292 = vmatmul.mubr.bf16.vlgmr.msra.gmra.mrb[96].mxu0 %v2122_v37 }
 0x406   : > { %v2013_v9 = vpop.f32.mrb[52].mxu1  ;;  %3816 = vmatpush3.bf16.msra.mxu0 %v4343_v7 }
 0x407   : > { %v2015_v11 = vpop.f32.mrb[53].mxu1  ;;  %3817 = vmatprep.subr.bf16.mxu0 %v4344_v8  ;;  %v4362_v8 = vld [vmem:[%s5502_s5 + $0x150] sm:$0xff]  }
 0x408   : > { %v2017_v41 = vpop.f32.mrb[54].mxu1 }
 0x409   : > { %v2124_v42 = vpack.c.bf16 %v2017_v41, %v2013_v9  ;;  %v2019_v12 = vpop.f32.mrb[55].mxu1 }
 0x40a   : > { %v2125_v14 = vpack.c.bf16 %v2019_v12, %v2015_v11  ;;  %3818 = vmatpush3.bf16.msra.mxu0 %v4345_v10 }
 0x40b   : > { %3819 = vmatprep.subr.bf16.mxu0 %v4346_v39  ;;  %v4366_v39 = vld [vmem:[%s5502_s5 + $0x160] sm:$0xff]  }
 0x40c   : > { %2299 = vmatprep.mubr.bf16.mxu0 %v2125_v14  ;;  %v4370_v14 = vld [vmem:[%s5502_s5 + $0x170] sm:$0xff]  }
 0x40d   : > { %2300 = vmatmul.mubr.bf16.gmra.mrb[100].mxu0 %v2124_v42 }
 0x40e   : > { %v2023_v47 = vpop.f32.mrb[56].mxu1  ;;  %3820 = vmatpush3.bf16.msra.mxu0 %v4347_v44 }
 0x40f   : > { %v2025_v52 = vpop.f32.mrb[57].mxu1  ;;  %3821 = vmatprep.subr.bf16.mxu0 %v4348_v46 }
 0x410   : > { %v2027_v51 = vpop.f32.mrb[58].mxu1 }
 0x411   : > { %v2126_v56 = vpack.c.bf16 %v2027_v51, %v2023_v47  ;;  %v2029_v57 = vpop.f32.mrb[59].mxu1 }
 0x412   : > { %v2127_v13 = vpack.c.bf16 %v2029_v57, %v2025_v52  ;;  %3822 = vmatpush3.bf16.msra.mxu0 %v4349_v49 }
 0x413   : > { %3823 = vmatprep.subr.bf16.mxu0 %v4350_v54 }
 0x414   : > { %2307 = vmatprep.mubr.bf16.mxu0 %v2127_v13 }
 0x415   : > { %2308 = vmatmul.mubr.bf16.gmra.mrb[104].mxu0 %v2126_v56  ;;  %v4383_v56 = vld [vmem:[%s5505_s8 + $0x18] sm:$0xff]  }
 0x416   : > { %v2033_v17 = vpop.f32.mrb[60].mxu1  ;;  %3824 = vmatpush3.bf16.msra.mxu0 %v4351_v15  ;;  %v4384_v15 = vld [vmem:[%s5505_s8 + $0x20] sm:$0xff]  }
 0x417   : > { %v2035_v20 = vpop.f32.mrb[61].mxu1  ;;  %3825 = vmatprep.subr.bf16.mxu0 %v4352_v16 }
 0x418   : > { %v2037_v25 = vpop.f32.mrb[62].mxu1 }
 0x419   : > { %v2128_v28 = vpack.c.bf16 %v2037_v25, %v2033_v17  ;;  %v2039_v0 = vpop.f32.mrb[63].mxu1 }
 0x41a   : > { %v2129_v30 = vpack.c.bf16 %v2039_v0, %v2035_v20  ;;  %3826 = vmatpush3.bf16.msra.mxu0 %v4353_v18  ;;  %v4386_v0 = vld [vmem:[%s5505_s8 + $0x30] sm:$0xff]  }
 0x41b   : > { %3827 = vmatprep.subr.bf16.mxu0 %v4354_v23  ;;  %v4385_v23 = vld [vmem:[%s5505_s8 + $0x28] sm:$0xff]  }
 0x41c   : > { %2315 = vmatprep.mubr.bf16.mxu0 %v2129_v30 }
 0x41d   : > { %2316 = vmatmul.mubr.bf16.gmra.mrb[108].mxu0 %v2128_v28 }
 0x41e   : > { %3828 = vmatpush3.bf16.msra.mxu0 %v4355_v19  ;;  %2452 = vmatprep.mubr.bf16.mxu0 %v2083_v24  ;;  %v5262_v33 = vpop.f32.mrb[64].mxu1  ;;  %v4360_v24 = vld [vmem:[%s5502_s5 + $0x148] sm:$0xff]  }
 0x41f   : > { %3829 = vmatprep.subr.bf16.mxu0 %v4356_v21  ;;  %v2045_v34 = vpop.f32.mrb[65].mxu1 }
 0x420   : > { %v2047_v36 = vpop.f32.mrb[66].mxu1 }
 0x421   : > { %v2485_v37 = vpack.c.bf16 %v2047_v36, %v5262_v33  ;;  %v2049_v5 = vpop.f32.mrb[67].mxu1 }
 0x422   : > { %3830 = vmatpush3.bf16.msra.mxu0 %v4357_v22  ;;  %v2486_v45 = vpack.c.bf16 %v2049_v5, %v2045_v34 }
 0x423   : > { %3855 = vmatprep.subr.bf16.mxu0 %v4358_v4 }
 0x425   : > { %2453 = vmatmul.mubr.bf16.vlgmr.msra.gmra.mrb[112].mxu0 %v2082_v43 }
 0x426   : > { %2460 = vmatprep.mubr.bf16.mxu0 %v2085_v55  ;;  %3856 = vmatpush3.bf16.msra.mxu0 %v4359_v38  ;;  %v2053_v7 = vpop.f32.mrb[68].mxu1 }
 0x427   : > { %3857 = vmatprep.subr.bf16.mxu0 %v4360_v24  ;;  %v2055_v9 = vpop.f32.mrb[69].mxu1 }
 0x428   : > { %v2057_v10 = vpop.f32.mrb[70].mxu1 }
 0x429   : > { %v2487_v11 = vpack.c.bf16 %v2057_v10, %v2053_v7  ;;  %v2059_v35 = vpop.f32.mrb[71].mxu1 }
 0x42a   : > { %3858 = vmatpush3.bf16.msra.mxu0 %v4361_v6  ;;  %v2488_v43 = vpack.c.bf16 %v2059_v35, %v2055_v9 }
 0x42b   : > { %3859 = vmatprep.subr.bf16.mxu0 %v4362_v8 }
 0x42d   : > { %2461 = vmatmul.mubr.bf16.gmra.mrb[116].mxu0 %v2084_v50 }
 0x42e   : > { %2468 = vmatprep.mubr.bf16.mxu0 %v2087_v60  ;;  %3860 = vmatpush3.bf16.msra.mxu0 %v4363_v40  ;;  %v2063_v55 = vpop.f32.mrb[72].mxu1 }
 0x42f   : > { %3861 = vmatprep.subr.bf16.mxu0 %v4364_v27  ;;  %v2065_v41 = vpop.f32.mrb[73].mxu1 }
 0x430   : > { %v2067_v42 = vpop.f32.mrb[74].mxu1 }
 0x431   : > { %v2489_v12 = vpack.c.bf16 %v2067_v42, %v2063_v55  ;;  %v2069_v26 = vpop.f32.mrb[75].mxu1 }
 0x432   : > { %3862 = vmatpush3.bf16.msra.mxu0 %v4365_v53  ;;  %v2490_v50 = vpack.c.bf16 %v2069_v26, %v2065_v41 }
 0x433   : > { %3863 = vmatprep.subr.bf16.mxu0 %v4366_v39 }
 0x435   : > { %2469 = vmatmul.mubr.bf16.gmra.mrb[120].mxu0 %v2086_v31 }
 0x436   : > { %2476 = vmatprep.mubr.bf16.mxu0 %v2089_v3  ;;  %3864 = vmatpush3.bf16.msra.mxu0 %v4367_v48  ;;  %v2073_v60 = vpop.f32.mrb[76].mxu1  ;;  %v4382_v3 = vld [vmem:[%s5505_s8 + $0x10] sm:$0xff]  }
 0x437   : > { %3865 = vmatprep.subr.bf16.mxu0 %v4368_v59  ;;  %v2075_v44 = vpop.f32.mrb[77].mxu1 }
 0x438   : > { %v2077_v46 = vpop.f32.mrb[78].mxu1 }
 0x439   : > { %v2491_v47 = vpack.c.bf16 %v2077_v46, %v2073_v60  ;;  %v2079_v58 = vpop.f32.mrb[79].mxu1 }
 0x43a   : > { %3866 = vmatpush3.bf16.msra.mxu0 %v4369_v32  ;;  %v2492_v31 = vpack.c.bf16 %v2079_v58, %v2075_v44 }
 0x43b   : > { %3867 = vmatprep.subr.bf16.mxu0 %v4370_v14 }
 0x43d   : > { %2477 = vmatmul.mubr.bf16.gmra.mrb[124].mxu0 %v2088_v1  ;;  %v4381_v1 = vld [vmem:[%s5505_s8 + $0x8] sm:$0xff]  }
 0x43e   : > { %3868 = vmatpush3.bf16.msra.mxu0 %v4371_v29  ;;  %2654 = vmatprep.mubr.bf16.mxu0 %v2486_v45 }
 0x43f   : > { %3869 = vmatprep.subr.bf16.mxu0 %v4372_v62 }
 0x442   : > { %3870 = vmatpush3.bf16.msra.mxu0 %v4373_v2 }
 0x443   : > { %3982 = vmatprep.subr.bf16.mxu0 %v4380_v63 }
 0x445   : > { %2655 = vmatmul.mubr.bf16.vlgmr.msra.gmra.mrb[128].mxu0 %v2485_v37 }
 0x446   : > { %2662 = vmatprep.mubr.bf16.mxu0 %v2488_v43  ;;  %3983 = vmatpush3.bf16.msra.mxu0 %v4380_v63 }
 0x447   : > { %3984 = vmatprep.subr.bf16.mxu0 %v4381_v1 }
 0x44a   : > { %3985 = vmatpush3.bf16.msra.mxu0 %v4381_v1 }
 0x44b   : > { %3986 = vmatprep.subr.bf16.mxu0 %v4382_v3 }
 0x44d   : > { %2663 = vmatmul.mubr.bf16.gmra.mrb[132].mxu0 %v2487_v11 }
 0x44e   : > { %2670 = vmatprep.mubr.bf16.mxu0 %v2490_v50  ;;  %3987 = vmatpush3.bf16.msra.mxu0 %v4382_v3 }
 0x44f   : > { %3988 = vmatprep.subr.bf16.mxu0 %v4383_v56 }
 0x452   : > { %3989 = vmatpush3.bf16.msra.mxu0 %v4383_v56 }
 0x453   : > { %3990 = vmatprep.subr.bf16.mxu0 %v4384_v15 }
 0x455   : > { %2671 = vmatmul.mubr.bf16.gmra.mrb[136].mxu0 %v2489_v12 }
 0x456   : > { %2678 = vmatprep.mubr.bf16.mxu0 %v2492_v31  ;;  %3991 = vmatpush3.bf16.msra.mxu0 %v4384_v15 }
 0x457   : > { %3992 = vmatprep.subr.bf16.mxu0 %v4385_v23 }
 0x45a   : > { %3993 = vmatpush3.bf16.msra.mxu0 %v4385_v23 }
 0x45b   : > { %3994 = vmatprep.subr.bf16.mxu0 %v4386_v0 }
 0x45d   : > { %2679 = vmatmul.mubr.bf16.gmra.mrb[140].mxu0 %v2491_v47 }
 0x45e   : > { %3995 = vmatpush3.bf16.msra.mxu0 %v4386_v0 }
 0x4d8   : > { %v3791_v49 = vpop.f32.mrb[96].mxu0 }
 0x4d9   : > { %v3792_v52 = vpop.f32.mrb[97].mxu0 }
 0x4da   : > { %v3793_v54 = vadd.f32 %v3792_v52, %v3791_v49  ;;  %v3794_v51 = vpop.f32.mrb[98].mxu0  ;;  %v3696_v49 = vld [vmem:[%s5503_s6] ss:$0 sm:$0xff] }
 0x4db   : > { %v3795_v57 = vpop.f32.mrb[99].mxu0 }
 0x4dc   : > { %v3796_v13 = vadd.f32 %v3795_v57, %v3794_v51 }
 0x4e0   : > { %v3797_v16 = vpop.f32.mrb[100].mxu0 }
 0x4e1   : > { %v3798_v17 = vpop.f32.mrb[101].mxu0 }
 0x4e2   : > { %v3799_v18 = vadd.f32 %v3798_v17, %v3797_v16  ;;  %v3800_v20 = vpop.f32.mrb[102].mxu0 }
 0x4e3   : > { %v3801_v25 = vpop.f32.mrb[103].mxu0 }
 0x4e4   : > { %v3802_v28 = vadd.f32 %v3801_v25, %v3800_v20 }
 0x4e8   : > { %v3803_v30 = vpop.f32.mrb[104].mxu0 }
 0x4e9   : > { %v3804_v19 = vpop.f32.mrb[105].mxu0 }
 0x4ea   : > { %v3805_v21 = vadd.f32 %v3804_v19, %v3803_v30  ;;  %v3806_v22 = vpop.f32.mrb[106].mxu0 }
 0x4eb   : > { %v3807_v33 = vpop.f32.mrb[107].mxu0 }
 0x4ec   : > { %v3808_v4 = vadd.f32 %v3807_v33, %v3806_v22 }
 0x4f0   : > { %v3809_v34 = vpop.f32.mrb[108].mxu0 }
 0x4f1   : > { %v3810_v36 = vpop.f32.mrb[109].mxu0 }
 0x4f2   : > { %v3811_v37 = vadd.f32 %v3810_v36, %v3809_v34  ;;  %v3812_v5 = vpop.f32.mrb[110].mxu0 }
 0x4f3   : > { %v3813_v38 = vpop.f32.mrb[111].mxu0 }
 0x4f4   : > { %v3814_v45 = vadd.f32 %v3813_v38, %v3812_v5 }
 0x4f8   : > { %v3831_v24 = vpop.f32.mrb[112].mxu0 }
 0x4f9   : > { %v3832_v6 = vpop.f32.mrb[113].mxu0 }
 0x4fa   : > { %v3833_v7 = vadd.f32 %v3832_v6, %v3831_v24  ;;  %v3834_v8 = vpop.f32.mrb[114].mxu0 }
 0x4fb   : > { %v3835_v9 = vpop.f32.mrb[115].mxu0 }
 0x4fc   : > { %v2455_v10 = vadd.f32 %v3833_v7, %v3793_v54  ;;  %v3836_v11 = vadd.f32 %v3835_v9, %v3834_v8 }
 0x4fe   : > { %v2458_v35 = vadd.f32 %v3836_v11, %v3796_v13 }
 0x500   : > { %v3837_v40 = vpop.f32.mrb[116].mxu0 }
 0x501   : > { %v3838_v43 = vpop.f32.mrb[117].mxu0 }
 0x502   : > { %v3839_v27 = vadd.f32 %v3838_v43, %v3837_v40  ;;  %v3840_v53 = vpop.f32.mrb[118].mxu0 }
 0x503   : > { %v3841_v55 = vpop.f32.mrb[119].mxu0 }
 0x504   : > { %v2463_v39 = vadd.f32 %v3839_v27, %v3799_v18  ;;  %v3842_v41 = vadd.f32 %v3841_v55, %v3840_v53 }
 0x506   : > { %v2466_v42 = vadd.f32 %v3842_v41, %v3802_v28 }
 0x508   : > { %v3843_v12 = vpop.f32.mrb[120].mxu0 }
 0x509   : > { %v3844_v26 = vpop.f32.mrb[121].mxu0 }
 0x50a   : > { %v3845_v48 = vadd.f32 %v3844_v26, %v3843_v12  ;;  %v3846_v50 = vpop.f32.mrb[122].mxu0 }
 0x50b   : > { %v3847_v59 = vpop.f32.mrb[123].mxu0 }
 0x50c   : > { %v2471_v32 = vadd.f32 %v3845_v48, %v3805_v21  ;;  %v3848_v60 = vadd.f32 %v3847_v59, %v3846_v50 }
 0x50e   : > { %v2474_v14 = vadd.f32 %v3848_v60, %v3808_v4  ;;  %v4376_v60 = vld [vmem:[%s5504_s7 + $0x10] sm:$0xff]  }
 0x510   : > { %v3849_v44 = vpop.f32.mrb[124].mxu0 }
 0x511   : > { %v3850_v46 = vpop.f32.mrb[125].mxu0 }
 0x512   : > { %v3851_v47 = vadd.f32 %v3850_v46, %v3849_v44  ;;  %v3852_v58 = vpop.f32.mrb[126].mxu0  ;;  %v4378_v44 = vld [vmem:[%s5504_s7 + $0x20] sm:$0xff]   ;;  %v4379_v46 = vld [vmem:[%s5504_s7 + $0x28] sm:$0xff]  }
 0x513   : > { %v3853_v29 = vpop.f32.mrb[127].mxu0 }
 0x514   : > { %v2479_v31 = vadd.f32 %v3851_v47, %v3811_v37  ;;  %v3854_v62 = vadd.f32 %v3853_v29, %v3852_v58  ;;  %v4388_v47 = vld [vmem:[%s5505_s8 + $0x40] sm:$0xff]   ;;  %v4390_v58 = vld [vmem:[%s5505_s8 + $0x48] sm:$0xff]   ;;  %v4392_v29 = vld [vmem:[%s5505_s8 + $0x50] sm:$0xff]  }
 0x516   : > { %v2482_v2 = vadd.f32 %v3854_v62, %v3814_v45  ;;  %v4394_v62 = vld [vmem:[%s5505_s8 + $0x58] sm:$0xff]  }
 0x518   : > { %v3871_v61 = vpop.f32.mrb[128].mxu0 }
 0x519   : > { %v3872_v63 = vpop.f32.mrb[129].mxu0 }
 0x51a   : > { %v3873_v1 = vadd.f32 %v3872_v63, %v3871_v61  ;;  %v3874_v3 = vpop.f32.mrb[130].mxu0  ;;  %v4396_v61 = vld [vmem:[%s5505_s8 + $0x60] sm:$0xff]   ;;  %v4398_v63 = vld [vmem:[%s5505_s8 + $0x68] sm:$0xff]  }
 0x51b   : > { %v3875_v52 = vpop.f32.mrb[131].mxu0 }
 0x51c   : > { %v2687_v54 = vadd.f32 %v3873_v1, %v2455_v10  ;;  %v3876_v51 = vadd.f32 %v3875_v52, %v3874_v3  ;;  %v4400_v1 = vld [vmem:[%s5505_s8 + $0x70] sm:$0xff]   ;;  %v4402_v3 = vld [vmem:[%s5505_s8 + $0x78] sm:$0xff]  }
 0x51e   : > { %v2702_v56 = vadd.f32 %v3696_v49, %v2687_v54  ;;  %v2688_v57 = vadd.f32 %v3876_v51, %v2458_v35 }
 0x520   : > { %v2703_v13 = vadd.f32 %v3696_v49, %v2688_v57  ;;  %v3877_v15 = vpop.f32.mrb[132].mxu0  ;;  %v2710_v17 = vmax.f32 %v2702_v56, 0.0 }
 0x521   : > { %v3878_v16 = vpop.f32.mrb[133].mxu0 }
 0x522   : > { %v2711_v18 = vmax.f32 %v2703_v13, 0.0  ;;  %v3879_v20 = vadd.f32 %v3878_v16, %v3877_v15  ;;  %v3880_v23 = vpop.f32.mrb[134].mxu0  ;;  %v4391_v13 = vld [vmem:[%s5505_s8 + $0x88] sm:$0xff]   ;;  %v4393_v16 = vld [vmem:[%s5505_s8 + $0x90] sm:$0xff]  }
 0x523   : > { %v3881_v25 = vpop.f32.mrb[135].mxu0 }
 0x524   : > { %v2689_v28 = vadd.f32 %v3879_v20, %v2463_v39  ;;  %v3882_v0 = vadd.f32 %v3881_v25, %v3880_v23  ;;  %v2718_v30 = vpack.c.bf16 %v2711_v18, %v2710_v17 }
 0x526   : > { %v2704_v19 = vadd.f32 %v3696_v49, %v2689_v28  ;;  %v2690_v21 = vadd.f32 %v3882_v0, %v2466_v42  ;;  %3942 = vmatprep.subr.bf16.mxu1 %v2718_v30  ;;  %v4395_v28 = vld [vmem:[%s5505_s8 + $0x98] sm:$0xff]  }
 0x527   : > { %3943 = vmatpush3.bf16.msra.mxu1 %v2718_v30  ;;  %v4397_v30 = vld [vmem:[%s5505_s8 + $0xa0] sm:$0xff]  }
 0x528   : > { %v2705_v22 = vadd.f32 %v3696_v49, %v2690_v21  ;;  %v3883_v33 = vpop.f32.mrb[136].mxu0  ;;  %v2712_v34 = vmax.f32 %v2704_v19, 0.0 }
 0x529   : > { %v3884_v4 = vpop.f32.mrb[137].mxu0 }
 0x52a   : > { %v2713_v36 = vmax.f32 %v2705_v22, 0.0  ;;  %v3885_v37 = vadd.f32 %v3884_v4, %v3883_v33  ;;  %v3886_v5 = vpop.f32.mrb[138].mxu0 }
 0x52b   : > { %v3887_v38 = vpop.f32.mrb[139].mxu0 }
 0x52c   : > { %v2691_v45 = vadd.f32 %v3885_v37, %v2471_v32  ;;  %v3888_v24 = vadd.f32 %v3887_v38, %v3886_v5  ;;  %v2719_v6 = vpack.c.bf16 %v2713_v36, %v2712_v34  ;;  %v4375_v32 = vld [vmem:[%s5504_s7 + $0x8] sm:$0xff]   ;;  %v4401_v36 = vld [vmem:[%s5505_s8 + $0xb0] sm:$0xff]   ;;  %v4403_v37 = vld [vmem:[%s5505_s8 + $0xb8] sm:$0xff]   ;;  %v4472_v5 = vmov 0.0  }
 0x52d   : > { %v4399_v34 = vld [vmem:[%s5505_s8 + $0xa8] sm:$0xff]  }
 0x52e   : > { %v2706_v7 = vadd.f32 %v3696_v49, %v2691_v45  ;;  %v2692_v8 = vadd.f32 %v3888_v24, %v2474_v14  ;;  %3944 = vmatprep.subr.bf16.mxu1 %v2719_v6  ;;  %v4377_v14 = vld [vmem:[%s5504_s7 + $0x18] sm:$0xff]  }
 0x52f   : > { %3945 = vmatpush3.bf16.msra.mxu1 %v2719_v6 }
 0x530   : > { %v2707_v9 = vadd.f32 %v3696_v49, %v2692_v8  ;;  %v3889_v10 = vpop.f32.mrb[140].mxu0  ;;  %v2714_v35 = vmax.f32 %v2706_v7, 0.0  ;;  %v3765_v8 = vld [vmem:[%s5506_s9] ss:$0 sm:$0xff] }
 0x531   : > { %v3890_v11 = vpop.f32.mrb[141].mxu0 }
 0x532   : > { %v2715_v40 = vmax.f32 %v2707_v9, 0.0  ;;  %v3891_v43 = vadd.f32 %v3890_v11, %v3889_v10  ;;  %v3892_v27 = vpop.f32.mrb[142].mxu0 }
 0x533   : > { %v3893_v53 = vpop.f32.mrb[143].mxu0 }
 0x534   : > { %v2693_v55 = vadd.f32 %v3891_v43, %v2479_v31  ;;  %v3894_v39 = vadd.f32 %v3893_v53, %v3892_v27  ;;  %v2720_v41 = vpack.c.bf16 %v2715_v40, %v2714_v35  ;;  %v4387_v31 = vld [vmem:[%s5505_s8 + $0x38] sm:$0xff]  }
 0x535   : > { %3996 = vmatprep.subr.bf16.mxu0 %v4387_v31 }
 0x536   : > { %v2708_v42 = vadd.f32 %v3696_v49, %v2693_v55  ;;  %v2694_v12 = vadd.f32 %v3894_v39, %v2482_v2  ;;  %3946 = vmatprep.subr.bf16.mxu1 %v2720_v41  ;;  %3997 = vmatpush3.bf16.msra.mxu0 %v4387_v31  ;;  %v4389_v2 = vld [vmem:[%s5505_s8 + $0x80] sm:$0xff]  }
 0x537   : > { %3947 = vmatpush3.bf16.msra.mxu1 %v2720_v41  ;;  %4002 = vmatprep.subr.bf16.mxu0 %v4389_v2 }
 0x538   : > { %v2709_v26 = vadd.f32 %v3696_v49, %v2694_v12  ;;  %v2716_v48 = vmax.f32 %v2708_v42, 0.0 }
 0x53a   : > { %v2717_v50 = vmax.f32 %v2709_v26, 0.0 }
 0x53c   : > { %v2721_v59 = vpack.c.bf16 %v2717_v50, %v2716_v48 }
 0x53e   : > { %3948 = vmatprep.subr.bf16.mxu1 %v2721_v59 }
 0x53f   : > { %3949 = vmatpush3.bf16.msra.mxu1 %v2721_v59 }
 0x540   : > { %3962 = vmatprep.subr.bf16.mxu1 %v4388_v47 }
 0x542   : > { %3951 = vmatmul.mubr.msk.bf16.vlgmr.msra.gmra.mrb[80].mxu1 %vm2764_vm0, %v4375_v32  ;;  %v3232_v32 = vld [vmem:[%s5507_s10] sm:$0xf] }
 0x543   : > { %3954 = vmatprep.mubr.msk.bf16.mxu1 %vm2764_vm0, %v4376_v60  ;;  %3963 = vmatpush3.bf16.msra.mxu1 %v4388_v47  ;;  %v4404_v60 = vld [vmem:[%s5508_s11] sm:$0xff]  }
 0x544   : > { %3964 = vmatprep.subr.bf16.mxu1 %v4390_v58 }
 0x547   : > { %3965 = vmatpush3.bf16.msra.mxu1 %v4390_v58 }
 0x548   : > { %3966 = vmatprep.subr.bf16.mxu1 %v4392_v29 }
 0x54a   : > { %3955 = vmatmul.mubr.msk.bf16.gmra.mrb[84].mxu1 %vm2764_vm0, %v4377_v14  ;;  %v4405_v14 = vld [vmem:[%s5508_s11 + $0x8] sm:$0xff]  }
 0x54b   : > { %3958 = vmatprep.mubr.msk.bf16.mxu1 %vm2764_vm0, %v4378_v44  ;;  %3967 = vmatpush3.bf16.msra.mxu1 %v4392_v29  ;;  %v4406_v44 = vld [vmem:[%s5508_s11 + $0x10] ss:$0 sps:$4 sm:$0xff]  }
 0x54c   : > { %3968 = vmatprep.subr.bf16.mxu1 %v4394_v62 }
 0x54f   : > { %3969 = vmatpush3.bf16.msra.mxu1 %v4394_v62 }
 0x550   : > { %3970 = vmatprep.subr.bf16.mxu1 %v4396_v61 }
 0x552   : > { %3959 = vmatmul.mubr.msk.bf16.gmra.mrb[88].mxu1 %vm2764_vm0, %v4379_v46  ;;  %v3304_v46 = vsel %vm3302_vm3, %v4406_v44, 0 }
 0x553   : > { %3971 = vmatpush3.bf16.msra.mxu1 %v4396_v61 }
 0x554   : > { %3972 = vmatprep.subr.bf16.mxu1 %v4398_v63 }
 0x557   : > { %3973 = vmatpush3.bf16.msra.mxu1 %v4398_v63 }
 0x558   : > { %3974 = vmatprep.subr.bf16.mxu1 %v4400_v1 }
 0x55b   : > { %3975 = vmatpush3.bf16.msra.mxu1 %v4400_v1 }
 0x55c   : > { %3976 = vmatprep.subr.bf16.mxu1 %v4402_v3 }
 0x55f   : > { %3977 = vmatpush3.bf16.msra.mxu1 %v4402_v3 }
 0x560   : > { %4022 = vmatprep.subr.bf16.mxu1 %v4472_v5 }
 0x615   : > { %v3952_v49 = vpop.f32.mrb[80].mxu1 }
 0x616   : > { %v2817_v52 = vpop.f32.mrb[81].mxu1 }
 0x617   : > { %v3953_v54 = vpop.f32.mrb[82].mxu1 }
 0x618   : > { %v2865_v51 = vpack.c.bf16 %v3953_v54, %v3952_v49  ;;  %v2820_v56 = vpop.f32.mrb[83].mxu1 }
 0x619   : > { %v2864_v57 = vpack.c.bf16 %v2820_v56, %v2817_v52 }
 0x61b   : > { %3998 = vmatprep.mubr.bf16.mxu0 %v2864_v57 }
 0x61c   : > { %3999 = vmatmul.mubr.bf16.vlgmr.msra.gmra.mrb[144].mxu0 %v2865_v51 }
 0x61d   : > { %4003 = vmatpush3.bf16.msra.mxu0 %v4389_v2  ;;  %v3956_v15 = vpop.f32.mrb[84].mxu1 }
 0x61e   : > { %4004 = vmatprep.subr.bf16.mxu0 %v4391_v13  ;;  %v2833_v17 = vpop.f32.mrb[85].mxu1 }
 0x61f   : > { %v3957_v18 = vpop.f32.mrb[86].mxu1 }
 0x620   : > { %v2883_v20 = vpack.c.bf16 %v3957_v18, %v3956_v15  ;;  %v2836_v23 = vpop.f32.mrb[87].mxu1 }
 0x621   : > { %4005 = vmatpush3.bf16.msra.mxu0 %v4391_v13  ;;  %v2882_v25 = vpack.c.bf16 %v2836_v23, %v2833_v17 }
 0x622   : > { %4006 = vmatprep.subr.bf16.mxu0 %v4393_v16 }
 0x623   : > { %3978 = vmatprep.mubr.bf16.mxu1 %v2882_v25 }
 0x624   : > { %3979 = vmatmul.mubr.bf16.vlgmr.msra.gmra.mrb[92].mxu1 %v2883_v20 }
 0x625   : > { %4007 = vmatpush3.bf16.msra.mxu0 %v4393_v16  ;;  %v3960_v0 = vpop.f32.mrb[88].mxu1  ;;  %4026 = vmatprep.mubr.msk.bf16.mxu1 %vm4473_vm1, %v4472_v5 }
 0x626   : > { %4008 = vmatprep.subr.bf16.mxu0 %v4395_v28  ;;  %v2849_v19 = vpop.f32.mrb[89].mxu1 }
 0x627   : > { %v3961_v21 = vpop.f32.mrb[90].mxu1 }
 0x628   : > { %v3096_v22 = vpack.c.bf16 %v3961_v21, %v3960_v0  ;;  %v2852_v33 = vpop.f32.mrb[91].mxu1 }
 0x629   : > { %4009 = vmatpush3.bf16.msra.mxu0 %v4395_v28  ;;  %v3095_v4 = vpack.c.bf16 %v2852_v33, %v2849_v19 }
 0x62a   : > { %4010 = vmatprep.subr.bf16.mxu0 %v4397_v30 }
 0x62b   : > { %4018 = vmatprep.mubr.bf16.mxu0 %v3095_v4 }
 0x62d   : > { %4011 = vmatpush3.bf16.msra.mxu0 %v4397_v30 }
 0x62e   : > { %4012 = vmatprep.subr.bf16.mxu0 %v4399_v34 }
 0x631   : > { %4013 = vmatpush3.bf16.msra.mxu0 %v4399_v34 }
 0x632   : > { %4014 = vmatprep.subr.bf16.mxu0 %v4401_v36 }
 0x635   : > { %4015 = vmatpush3.bf16.msra.mxu0 %v4401_v36 }
 0x636   : > { %4016 = vmatprep.subr.bf16.mxu0 %v4403_v37 }
 0x639   : > { %4017 = vmatpush3.bf16.msra.mxu0 %v4403_v37 }
 0x63c   : > { %4019 = vmatmul.mubr.bf16.vlgmr.msra.gmra.mrb[144].mxu0 %v3096_v22 }
 0x6f7   : > { %v3980_v38 = vpop.f32.mrb[92].mxu1 }
 0x6f8   : > { %v2983_v45 = vpop.f32.mrb[93].mxu1 }
 0x6f9   : > { %v3981_v24 = vpop.f32.mrb[94].mxu1 }
 0x6fa   : > { %v2986_v6 = vpop.f32.mrb[95].mxu1 }
 0x70f   : > { %v4020_v7 = vpop.f32.mrb[144].mxu0 }
 0x710   : > { %v4040_v9 = vadd.f32 %v4020_v7, %v3980_v38  ;;  %v3196_v10 = vpop.f32.mrb[145].mxu0 }
 0x711   : > { %v4041_v11 = vadd.f32 %v3196_v10, %v2983_v45  ;;  %v4021_v35 = vpop.f32.mrb[146].mxu0 }
 0x712   : > { %v3224_v40 = vadd.f32 %v4040_v9, %v3765_v8  ;;  %v4042_v43 = vadd.f32 %v4021_v35, %v3981_v24  ;;  %v3199_v27 = vpop.f32.mrb[147].mxu0 }
 0x713   : > { %v3222_v53 = vadd.f32 %v4041_v11, %v3765_v8  ;;  %v4043_v55 = vadd.f32 %v3199_v27, %v2986_v6 }
 0x714   : > { %v3225_v39 = vadd.f32 %v4042_v43, %v3765_v8  ;;  %v3228_v42 = vmax.f32 %v3224_v40, 0.0 }
 0x715   : > { %v3223_v41 = vadd.f32 %v4043_v55, %v3765_v8  ;;  %v3226_v26 = vmax.f32 %v3222_v53, 0.0 }
 0x716   : > { %v3229_v12 = vmax.f32 %v3225_v39, 0.0 }
 0x717   : > { %v3227_v48 = vmax.f32 %v3223_v41, 0.0 }
 0x718   : > { %v3231_v50 = vpack.c.bf16 %v3229_v12, %v3228_v42 }
 0x719   : > { %v3230_v59 = vpack.c.bf16 %v3227_v48, %v3226_v26 }
 0x71b   : > { %4023 = vmatpush3.bf16.msra.mxu1 %v3230_v59 }
 0x71c   : > { %4024 = vmatprep.subr.bf16.mxu1 %v4472_v5 }
 0x71f   : > { %4025 = vmatpush3.bf16.msra.mxu1 %v3231_v50 }
 0x720   : > { %4030 = vmatprep.subr.bf16.mxu1 %v4472_v5 }
 0x722   : > { %4027 = vmatmul.mubr.msk.bf16.vlgmr.msra.gmra.mrb[96].mxu1 %vm3233_vm2, %v3232_v32 }
 0x723   : > { %4031 = vmatpush3.bf16.msra.mxu1 %v4404_v60  ;;  %4036 = vmatprep.mubr.msk.bf16.mxu1 %vm4473_vm1, %v4472_v5 }
 0x724   : > { %4032 = vmatprep.subr.bf16.mxu1 %v4472_v5 }
 0x727   : > { %4033 = vmatpush3.bf16.msra.mxu1 %v4405_v14 }
 0x728   : > { %4034 = vmatprep.subr.bf16.mxu1 %v4472_v5 }
 0x72b   : > { %4035 = vmatpush3.bf16.msra.mxu1 %v3304_v46 }
 0x7f5   : > { %v3271_v47 = vpop.f32.mrb[96].mxu1 }
 0x7f6   : > { %v3277_v58 = vpack.c.bf16 %v3271_v47, %v3271_v47  ;;  %v4028_v29 = vpop.f32.mrb[97].mxu1 }
 0x7f7   : > { %v3274_v31 = vpop.f32.mrb[98].mxu1 }
 0x7f8   : > { %v4029_v62 = vpop.f32.mrb[99].mxu1  ;;  %4037 = vmatmul.mubr.msk.bf16.vlgmr.msra.gmra.mrb[100].mxu1 %vm3298_vm4, %v3277_v58 }
 0x8cb   : > { %v3340_v2 = vpop.f32.mrb[100].mxu1 }
 0x8cc   : > { %3347 = vst.msk [vmem:[%s407_s20] sm:$0xff] %vm3346_vm5, %v3340_v2  ;;  %v4038_v61 = vpop.f32.mrb[101].mxu1 }
 0x8cd   : > { %v3343_v63 = vpop.f32.mrb[102].mxu1 }
 0x8ce   : > { %4420 = shalt.err (!%p4417_p3)
}
 0x8cf   : > { %s4421_s17 = scalar_lea.hbm %s5455_s15, 128  ;;  %s4425_s29 = scalar_lea.hbm %s5509_s12, 256 }
 0x8d0   : > { %p4422_p4 = scmp.ne.s32.totalorder %s5455_s15, %s4421_s17  ;;  %p4426_p9 = scmp.lt.u32.totalorder %s5455_s15, %s5509_s12 }
 0x8d1   : > { %p4427_p10 = scmp.lt.u32.totalorder %s4425_s29, %s4421_s17  ;;  %p4429_p12 = scmp.lt.u32.totalorder %s4421_s17, %s5455_s15 }
 0x8d2   : > { %p4423_p7 = pnand %p4422_p4, %p4578_p5 }
 0x8d3   : > { %p4428_p11 = por %p4427_p10, %p4426_p9 }
 0x8d4   : > { %p4424_p8 = pneg %p4423_p7 }
 0x8d5   : > { %p4430_p13 = por %p4429_p12, %p4428_p11 }
 0x8d7   : > { %p4431_p0 = pnand %p4430_p13, %p4424_p8 }
 0x8d9   : > { %4434 = shalt.err (!%p4431_p0)
}
 0x8da   : > { %4112 = dma.vmem_to_hbm [thread:$0]  (%p4578_p5), %s5457_s26, 128, %s5455_s15, %s3349_s0   ;;  %v4039_v1 = vpop.f32.mrb[103].mxu1 }
 0x8db PF: > { %p4118_p1 = scmp.ge.s32.totalorder %s4469_s24, 2  ;;  %s3374_s16 = sand.u32 1, %s4457_s21  }
 0x8dc   : > { %s3375_s19 = scalar_lea.sflag [#allocation3], %s3374_s16 }
 0x8dd   : > { %p4115_p2 = pnand %p4118_p1, %p4582_p6 }
 0x8df   : > { %4452 = dma.done.wait (!%p4115_p2), %s3375_s19, 128  }
 0x8e0   : > { %4454 = vsyncadd (!%p4115_p2), %s3375_s19, 4294967168  ;;  %p22_p3 = scmp.ge.s32.totalorder %s4565_s27, 4   ;;  %s5514_s21 = smov %s4461_s22 }
 0x8e1   : > { %s5515_s22 = smov %s4465_s23  ;;  %s5516_s23 = smov %s4576_s30 }
 0x8e2   : > { %s5517_s24 = smov %s4565_s27  ;;  %24 = sbr.rel (!%p22_p3) target bundleno = 5 (0x5), region = 109 }
 0x8e9   :  { %3380 = vsyncpa [#allocation3], 1 }
 0x8ea   :  { %3382 = vsyncpa [#allocation3 + $0x1], 1 }

</bundles_post_ra>
